<compile_context>
chip_gen: v6e
topology: v6e:2x2x1
jax: 0.10.0
libtpu: 0.0.40
codegen_flags: <defaults>
</compile_context>

<pallas_src>
import functools

import jax
import jax.numpy as jnp
from jax.experimental import pallas as pl
from jax.experimental.pallas import tpu as pltpu


def _round_up(x, m):
    return (x + m - 1) // m * m


# ----------------------------------------------------------------------------
# Pallas kernel: batched per-(batch, channel) patch-correlation attention
# ----------------------------------------------------------------------------
def _corr_attn_kernel(scal_ref, p_ref, pb_ref, o_ref, *,
                      l1_pad, n_pad_rows, exp_dtype, needs_max):
    # scal_ref : (2,)  f32 SMEM  [scale*inv_base^2, scale*inv_base*inv_w]
    # p_ref    : (Gb, KK, Lp) bf16  full patches, layout [base|pad|down|pad]
    # pb_ref   : (Gb, KK, TN) bf16  current tile of base-image patch columns
    # o_ref    : (Gb, KK, TN) f32   output tile
    m_base = scal_ref[0]
    m_down = scal_ref[1]
    dn = (((0,), (0,)), ((), ()))

    def group_body(g, carry):
        p = p_ref[g]                      # (KK, Lp) bf16
        pb = pb_ref[g]                    # (KK, TN) bf16
        p_b = p[:, :l1_pad]               # base segment  (KK, L1p)
        p_d = p[:, l1_pad:]               # down segment  (KK, L2p)

        # Correlation against the current base-column tile (f32 MXU acc), with
        # the two global-normalization scalars folded in per segment.
        z_b = jax.lax.dot_general(
            p_b, pb, dn, preferred_element_type=jnp.float32) * m_base
        z_d = jax.lax.dot_general(
            p_d, pb, dn, preferred_element_type=jnp.float32) * m_down

        # Operands are globally L2-normalized, so |z| <= softmax_scale; the
        # max-subtraction pass is only traced when softmax_scale is large.
        if needs_max:
            zmax = jnp.maximum(
                jnp.maximum(jnp.max(z_b, axis=0, keepdims=True),
                            jnp.max(z_d, axis=0, keepdims=True)), 0.0)
            z_b = z_b - zmax
            z_d = z_d - zmax
            pad_corr = n_pad_rows * jnp.exp(-zmax)       # (1, TN)
        else:
            pad_corr = n_pad_rows                        # scalar constant

        # exp in bf16 on bf16-EUP parts (v6e/v7x), f32 otherwise.
        e_b = jnp.exp(z_b.astype(exp_dtype))
        e_d = jnp.exp(z_d.astype(exp_dtype))

        # Column-softmax denominator with f32 accumulation.  Zero pad rows
        # contribute exp(0)=1 each, so we subtract that constant instead of
        # carrying any per-row mask over the big map.
        den = (jnp.sum(e_b.astype(jnp.float32), axis=0, keepdims=True)
               + jnp.sum(e_d.astype(jnp.float32), axis=0, keepdims=True)
               - pad_corr)

        # Re-projection onto the raw (unnormalized) patches; the softmax
        # denominator is folded into the small (KK, TN) result.
        num = (jnp.dot(p_b, e_b.astype(jnp.bfloat16),
                       preferred_element_type=jnp.float32)
               + jnp.dot(p_d, e_d.astype(jnp.bfloat16),
                         preferred_element_type=jnp.float32))

        o_ref[g] = (num * pl.reciprocal(den, approx=True)).astype(o_ref.dtype)
        return carry

    # fori_loop (not a Python unroll) bounds live ranges: one (Lp, TN) softmax
    # temporary regardless of how many (b, c) groups are batched per step.
    jax.lax.fori_loop(0, p_ref.shape[0], group_body, 0)


def _corr_attention_core(scal, patch_all, *, l1_pad, tn, gb, n_pad_rows,
                         exp_dtype, needs_max, vmem_limit):
    Gp, KK, Lp = patch_all.shape
    grid = (Gp // gb, l1_pad // tn)

    kernel = functools.partial(
        _corr_attn_kernel, l1_pad=l1_pad, n_pad_rows=float(n_pad_rows),
        exp_dtype=exp_dtype, needs_max=needs_max)

    cost = pl.CostEstimate(
        flops=int(4 * Gp * KK * Lp * l1_pad),            # two matmuls
        transcendentals=int(Gp * Lp * l1_pad),           # exp
        bytes_accessed=int(Gp * KK * (Lp * 2 + l1_pad * 2 + l1_pad * 4) + 8),
    )

    # TODO(synk): reading the base tile straight out of the resident patch
    # block (lane-aligned dynamic slice) would drop the small redundant
    # per-tile DMA of the 3rd input.
    return pl.pallas_call(
        kernel,
        out_shape=jax.ShapeDtypeStruct((Gp, KK, l1_pad), jnp.float32),
        grid=grid,
        in_specs=[
            pl.BlockSpec(memory_space=pltpu.MemorySpace.SMEM),      # scalars
            pl.BlockSpec((gb, KK, Lp), lambda g, n: (g, 0, 0)),     # patches
            pl.BlockSpec((gb, KK, tn), lambda g, n: (g, 0, n)),     # base tile
        ],
        out_specs=pl.BlockSpec((gb, KK, tn), lambda g, n: (g, 0, n)),
        compiler_params=pltpu.CompilerParams(
            # Axis 0 (groups) carries the cross-TensorCore split so each core
            # keeps a private resident patch block; axis 1 reuses that block.
            dimension_semantics=("parallel", "arbitrary"),
            vmem_limit_bytes=int(vmem_limit)),
        cost_estimate=cost,
    )(scal, patch_all, patch_all)


# ----------------------------------------------------------------------------
# Generation-aware configuration
# ----------------------------------------------------------------------------
def _device_config():
    kind = ""
    try:
        kind = jax.devices()[0].device_kind.lower()
    except Exception:
        pass
    vmem_cap = 0
    try:
        vmem_cap = int(pltpu.get_tpu_info().vmem_capacity_bytes)
    except Exception:
        vmem_cap = 0
    if vmem_cap <= 0:
        vmem_cap = (64 << 20) if "v7" in kind else (128 << 20)
    # Leave headroom: ~48 MiB scoped on v7x, ~96 MiB on 128 MiB v5e/v6e parts.
    vmem_budget = (vmem_cap * 3) // 4
    # bf16 EUP/VPU exists on v6e and newer; keep softmax math in f32 on <= v5.
    old_gen = any(t in kind for t in ("v2", "v3", "v4", "v5"))
    exp_dtype = jnp.float32 if old_gen else jnp.bfloat16
    return vmem_budget, exp_dtype


def _pick_tiles(L1, L2, G, KK, exp_bytes, vmem_budget):
    L1p = _round_up(L1, 128)
    L2p = _round_up(L2, 128)
    # Batch several (b, c) groups per grid step; keep >= 2 steps on the group
    # axis so the v7x megacore split lands there.
    gb = max(1, min(8, G // 2)) if G >= 2 else 1

    def need(tn, l1p_full):
        lp = l1p_full + L2p
        return (lp * tn * (8 + exp_bytes)             # s + e (+ f32 sum temp)
                + 2 * gb * KK * (lp * 2 + tn * 6)     # double-buffered in/out
                + (2 << 20))

    budget = (vmem_budget * 4) // 5
    if need(L1p, L1p) <= budget:
        return gb, L1p, L1p, L2p                      # single base-column tile
    for tn in (1024, 512, 256, 128):
        if tn < L1p and need(tn, _round_up(L1p, tn)) <= budget:
            return gb, tn, _round_up(L1p, tn), L2p
    # TODO(synk): online-softmax tiling of the row (Lp) axis for images where
    # even TN=128 exceeds the VMEM budget (hits v7x ~2x earlier than v5e/v6e).
    return gb, 128, _round_up(L1p, 128), L2p


# ----------------------------------------------------------------------------
# Plain-JAX glue (1x1 conv + PReLU, unfold, fold, bilinear /2 downsample)
# ----------------------------------------------------------------------------
def _conv1x1_prelu(x, w, b, a):
    y = jnp.einsum('bchw,oc->bohw', x, w) + b[None, :, None, None]
    return jnp.where(y >= 0, y, a * y)


def _downsample_bilinear_half(x):
    # F.interpolate(scale_factor=0.5, mode='bilinear', align_corners=False)
    # with even H, W is exactly 2x2 average pooling.
    # TODO(synk): odd H/W would need true bilinear resampling to match torch.
    B, C, H, W = x.shape
    return x.reshape(B, C, H // 2, 2, W // 2, 2).mean(axis=(3, 5))


def _unfold_patches(x, k):
    # nn.Unfold(k, stride=1), returned already split as (B, C, k*k, L)
    B, C, H, W = x.shape
    Hp, Wp = H - k + 1, W - k + 1
    cols = [x[:, :, dy:dy + Hp, dx:dx + Wp].reshape(B, C, Hp * Wp)
            for dy in range(k) for dx in range(k)]
    return jnp.stack(cols, axis=2)  # (B, C, k*k, Hp*Wp)


def _fold_patches(p, H, W, k):
    # nn.Fold(output_size=(H,W), kernel_size=k, stride=1): overlap-add.
    B, C, KK, L = p.shape
    Hp, Wp = H - k + 1, W - k + 1
    p = p.reshape(B, C, k, k, Hp, Wp)
    out = jnp.zeros((B, C, H, W), p.dtype)
    for dy in range(k):
        for dx in range(k):
            out = out.at[:, :, dy:dy + Hp, dx:dx + Wp].add(p[:, :, dy, dx])
    return out


# ----------------------------------------------------------------------------
# Full forward
# ----------------------------------------------------------------------------
def patch_corr_attention(x, params, *, kernel_size=3, softmax_scale=10.0,
                         res_scale=1.0):
    B, C, H, W = x.shape
    k = kernel_size
    KK = k * k

    # conv_match1 + global L2-norm normalization scalar (max over batch norms)
    base = _conv1x1_prelu(x, params['w_m1'], params['b_m1'], params['a_m1'])
    inv_base = 1.0 / jnp.max(jnp.sqrt(jnp.sum(base ** 2, axis=(1, 2, 3))))

    # downsampled branch: conv_match2 + its normalization scalar
    ref_down = _downsample_bilinear_half(x)
    w = _conv1x1_prelu(ref_down, params['w_m2'], params['b_m2'], params['a_m2'])
    inv_w = 1.0 / jnp.max(jnp.sqrt(jnp.sum(w ** 2, axis=(1, 2, 3))))

    base_p = _unfold_patches(base, k)          # (B, Cr, KK, L1)
    w_p = _unfold_patches(w, k)                # (B, Cr, KK, L2)
    Cr = base_p.shape[1]
    L1 = base_p.shape[-1]
    L2 = w_p.shape[-1]
    G = B * Cr

    vmem_budget, exp_dtype = _device_config()
    exp_bytes = 2 if exp_dtype == jnp.bfloat16 else 4
    Gb, TN, L1_pad, L2_pad = _pick_tiles(L1, L2, G, KK, exp_bytes, vmem_budget)
    G_pad = _round_up(G, Gb)

    # Lane-dense [base | pad | down | pad] layout, bf16 for MXU-native matmuls.
    base_blk = jnp.pad(base_p.reshape(G, KK, L1),
                       ((0, G_pad - G), (0, 0), (0, L1_pad - L1)))
    w_blk = jnp.pad(w_p.reshape(G, KK, L2),
                    ((0, G_pad - G), (0, 0), (0, L2_pad - L2)))
    patch_all = jnp.concatenate([base_blk, w_blk], axis=-1).astype(jnp.bfloat16)

    # Two per-segment scalars: softmax_scale times the product of the global
    # normalization scalars the reference applies to the correlation operands.
    scal = jnp.stack([softmax_scale * inv_base * inv_base,
                      softmax_scale * inv_base * inv_w]).astype(jnp.float32)

    # exp-overflow guard: with the global L2 normalization |corr| <= ~1, so
    # max-subtraction is only needed when softmax_scale itself is large.
    needs_max = float(softmax_scale) > 30.0
    n_pad_rows = (L1_pad - L1) + (L2_pad - L2)

    out = _corr_attention_core(
        scal, patch_all, l1_pad=L1_pad, tn=TN, gb=Gb, n_pad_rows=n_pad_rows,
        exp_dtype=exp_dtype, needs_max=needs_max,
        vmem_limit=vmem_budget)                     # (G_pad, KK, L1_pad) f32
    out = out[:G, :, :L1].reshape(B, Cr, KK, L1)

    # nn.Fold overlap-add followed by the reference's uniform /k^2 division.
    out = _fold_patches(out, H, W, k) / float(k * k)   # (B, Cr, H, W)

    y = _conv1x1_prelu(out, params['w_as'], params['b_as'], params['a_as'])
    return y + res_scale * x


# ----------------------------------------------------------------------------
# Pure-JAX f32 reference (dense (L, L) correlation + softmax), for validation
# ----------------------------------------------------------------------------
def _reference_forward(x, params, *, kernel_size=3, softmax_scale=10.0,
                       res_scale=1.0):
    B, C, H, W = x.shape
    k = kernel_size
    base = _conv1x1_prelu(x, params['w_m1'], params['b_m1'], params['a_m1'])
    base_max = jnp.max(jnp.sqrt(jnp.sum(base ** 2, axis=(1, 2, 3))))
    w = _conv1x1_prelu(_downsample_bilinear_half(x),
                       params['w_m2'], params['b_m2'], params['a_m2'])
    w_max = jnp.max(jnp.sqrt(jnp.sum(w ** 2, axis=(1, 2, 3))))
    bp = _unfold_patches(base, k)
    wp = _unfold_patches(w, k)
    L1 = bp.shape[-1]
    pa = jnp.concatenate([bp, wp], axis=-1)                     # (B,Cr,KK,L)
    pan = jnp.concatenate([bp / base_max, wp / w_max], axis=-1)
    yi = jnp.einsum('bckl,bckm->bclm', pan, pan)
    yi = jax.nn.softmax(yi * softmax_scale, axis=-2)
    out = jnp.einsum('bckl,bclm->bckm', pa, yi)[..., :L1]
    out = _fold_patches(out, H, W, k) / float(k * k)
    y = _conv1x1_prelu(out, params['w_as'], params['b_as'], params['a_as'])
    return y + res_scale * x


def init_params(key, channel, reduction):
    cr = channel // reduction
    k1, k2, k3, k4, k5, k6 = jax.random.split(key, 6)
    scale = 0.05
    return dict(
        w_m1=scale * jax.random.normal(k1, (cr, channel), jnp.float32),
        b_m1=scale * jax.random.normal(k2, (cr,), jnp.float32),
        a_m1=jnp.float32(0.25),   # PReLU default init
        w_m2=scale * jax.random.normal(k3, (cr, channel), jnp.float32),
        b_m2=scale * jax.random.normal(k4, (cr,), jnp.float32),
        a_m2=jnp.float32(0.25),
        w_as=scale * jax.random.normal(k5, (channel, cr), jnp.float32),
        b_as=scale * jax.random.normal(k6, (channel,), jnp.float32),
        a_as=jnp.float32(0.25),
    )


if __name__ == "__main__":
    B, C, H, W = 2, 4, 16, 16          # channel=4, reduction=2 -> Cr=2
    key = jax.random.PRNGKey(0)
    kx, kp = jax.random.split(key)
    x = jax.random.normal(kx, (B, C, H, W), jnp.float32)
    params = init_params(kp, channel=C, reduction=2)

    fwd = jax.jit(functools.partial(
        patch_corr_attention, kernel_size=3, softmax_scale=10.0, res_scale=1.0))
    y = fwd(x, params)
    jax.block_until_ready(y)

    assert y.shape == (B, C, H, W), y.shape
    assert bool(jnp.all(jnp.isfinite(y)))

    # Loose tolerance: bf16 patch operands + (optional) bf16 exp + approx
    # reciprocal vs the dense f32 reference.
    y_ref = _reference_forward(x, params, kernel_size=3, softmax_scale=10.0,
                               res_scale=1.0)
    err = float(jnp.max(jnp.abs(y - y_ref)))
    assert err < 1e-1, f"max abs error vs reference: {err}"

    print("KERNEL_OK")
</pallas_src>

<mosaic_0001>
module attributes {stable_mosaic.version = 11 : i64} {
  func.func @_corr_attn_kernel(%arg0: i32, %arg1: i32, %arg2: memref<2xf32, #tpu.memory_space<smem>>, %arg3: memref<2x9x384xbf16, #tpu.memory_space<vmem>>, %arg4: memref<2x9x256xbf16, #tpu.memory_space<vmem>>, %arg5: memref<2x9x256xf32, #tpu.memory_space<vmem>>) attributes {dimension_semantics = [#tpu.dimension_semantics<parallel>, #tpu.dimension_semantics<arbitrary>], iteration_bounds = array<i64: 2, 1>, scalar_prefetch = 0 : i64, scratch_operands = 0 : i64, tpu.core_type = #tpu.core_type<tc>, window_params = [{transform_indices = @transform_0, window_bounds = array<i64: 2>}, {transform_indices = @transform_1, window_bounds = array<i64: 2, 9, 384>}, {transform_indices = @transform_2, window_bounds = array<i64: 2, 9, 256>}, {transform_indices = @transform_3, window_bounds = array<i64: 2, 9, 256>}]} {
    %c0 = arith.constant 0 : index
    %0 = memref.load %arg2[%c0] : memref<2xf32, #tpu.memory_space<smem>>
    %c1 = arith.constant 1 : index
    %1 = memref.load %arg2[%c1] : memref<2xf32, #tpu.memory_space<smem>>
    %c0_i32 = arith.constant 0 : i32
    %c2_i32 = arith.constant 2 : i32
    %2 = arith.addi %c0_i32, %c2_i32 : i32
    %c1_i32 = arith.constant 1 : i32
    scf.for %arg6 = %c0_i32 to %2 step %c1_i32  : i32 {
      %3 = arith.index_cast %arg6 : i32 to index
      %c0_1 = arith.constant 0 : index
      %c0_2 = arith.constant 0 : index
      %4 = vector.load %arg3[%3, %c0_1, %c0_2] : memref<2x9x384xbf16, #tpu.memory_space<vmem>>, vector<1x9x384xbf16>
      %5 = vector.shape_cast %4 : vector<1x9x384xbf16> to vector<9x384xbf16>
      %6 = arith.index_cast %arg6 : i32 to index
      %c0_3 = arith.constant 0 : index
      %c0_4 = arith.constant 0 : index
      %7 = vector.load %arg4[%6, %c0_3, %c0_4] : memref<2x9x256xbf16, #tpu.memory_space<vmem>>, vector<1x9x256xbf16>
      %8 = vector.shape_cast %7 : vector<1x9x256xbf16> to vector<9x256xbf16>
      %9 = vector.extract_strided_slice %5 {offsets = [0, 0], sizes = [9, 256], strides = [1, 1]} : vector<9x384xbf16> to vector<9x256xbf16>
      %10 = vector.extract_strided_slice %5 {offsets = [0, 256], sizes = [9, 128], strides = [1, 1]} : vector<9x384xbf16> to vector<9x128xbf16>
      %cst = arith.constant dense<0.000000e+00> : vector<256x256xf32>
      %11 = tpu.matmul %9, %8, %cst {dimension_numbers = #tpu.dot_dimension_numbers<[0], [0], [1], [1], [0, 1, 1, 1], [], []>} : vector<9x256xbf16>, vector<9x256xbf16>, vector<256x256xf32> -> vector<256x256xf32>
      %12 = vector.broadcast %0 : f32 to vector<256x256xf32>
      %13 = arith.mulf %11, %12 : vector<256x256xf32>
      %cst_5 = arith.constant dense<0.000000e+00> : vector<128x256xf32>
      %14 = tpu.matmul %10, %8, %cst_5 {dimension_numbers = #tpu.dot_dimension_numbers<[0], [0], [1], [1], [0, 1, 1, 1], [], []>} : vector<9x128xbf16>, vector<9x256xbf16>, vector<128x256xf32> -> vector<128x256xf32>
      %15 = vector.broadcast %1 : f32 to vector<128x256xf32>
      %16 = arith.mulf %14, %15 : vector<128x256xf32>
      %17 = arith.truncf %13 : vector<256x256xf32> to vector<256x256xbf16>
      %18 = math.exp %17 : vector<256x256xbf16>
      %19 = arith.truncf %16 : vector<128x256xf32> to vector<128x256xbf16>
      %20 = math.exp %19 : vector<128x256xbf16>
      %21 = arith.extf %18 : vector<256x256xbf16> to vector<256x256xf32>
      %cst_6 = arith.constant dense<0.000000e+00> : vector<256xf32>
      %22 = vector.multi_reduction <add>, %21, %cst_6 [0] : vector<256x256xf32> to vector<256xf32>
      %23 = vector.shape_cast %22 : vector<256xf32> to vector<1x256xf32>
      %24 = arith.extf %20 : vector<128x256xbf16> to vector<128x256xf32>
      %cst_7 = arith.constant dense<0.000000e+00> : vector<256xf32>
      %25 = vector.multi_reduction <add>, %24, %cst_7 [0] : vector<128x256xf32> to vector<256xf32>
      %26 = vector.shape_cast %25 : vector<256xf32> to vector<1x256xf32>
      %27 = arith.addf %23, %26 : vector<1x256xf32>
      %cst_8 = arith.constant 1.520000e+02 : f32
      %28 = vector.broadcast %cst_8 : f32 to vector<1x256xf32>
      %29 = arith.subf %27, %28 : vector<1x256xf32>
      %cst_9 = arith.constant dense<0.000000e+00> : vector<9x256xf32>
      %30 = tpu.matmul %9, %18, %cst_9 {dimension_numbers = #tpu.dot_dimension_numbers<[1], [0], [0], [1], [0, 0, 1, 1], [], []>} : vector<9x256xbf16>, vector<256x256xbf16>, vector<9x256xf32> -> vector<9x256xf32>
      %cst_10 = arith.constant dense<0.000000e+00> : vector<9x256xf32>
      %31 = tpu.matmul %10, %20, %cst_10 {dimension_numbers = #tpu.dot_dimension_numbers<[1], [0], [0], [1], [0, 0, 1, 1], [], []>} : vector<9x128xbf16>, vector<128x256xbf16>, vector<9x256xf32> -> vector<9x256xf32>
      %32 = arith.addf %30, %31 : vector<9x256xf32>
      %33 = tpu.reciprocal %29 {approx = true} : vector<1x256xf32> -> vector<1x256xf32>
      %34 = vector.broadcast %33 : vector<1x256xf32> to vector<9x256xf32>
      %35 = arith.mulf %32, %34 : vector<9x256xf32>
      %36 = arith.index_cast %arg6 : i32 to index
      %c0_11 = arith.constant 0 : index
      %c0_12 = arith.constant 0 : index
      %37 = vector.load %arg5[%36, %c0_11, %c0_12] : memref<2x9x256xf32, #tpu.memory_space<vmem>>, vector<1x9x256xf32>
      %38 = vector.shape_cast %37 : vector<1x9x256xf32> to vector<9x256xf32>
      %39 = vector.shape_cast %35 : vector<9x256xf32> to vector<1x9x256xf32>
      tpu.vector_store %arg5[%36, %c0_11, %c0_12], %39 {strides = array<i32>} : memref<2x9x256xf32, #tpu.memory_space<vmem>>, vector<1x9x256xf32>,
    }
    %c2_i32_0 = arith.constant 2 : i32
    return
  }
  func.func @transform_0(%arg0: i32, %arg1: i32) -> i32 {
    %c0_i32 = arith.constant 0 : i32
    %c0_i32_0 = arith.constant 0 : i32
    return %c0_i32 : i32
  }
  func.func @transform_1(%arg0: i32, %arg1: i32) -> (i32, i32, i32) {
    %c0_i32 = arith.constant 0 : i32
    %c0_i32_0 = arith.constant 0 : i32
    %c0_i32_1 = arith.constant 0 : i32
    return %arg0, %c0_i32, %c0_i32_0 : i32, i32, i32
  }
  func.func @transform_2(%arg0: i32, %arg1: i32) -> (i32, i32, i32) {
    %c0_i32 = arith.constant 0 : i32
    %c0_i32_0 = arith.constant 0 : i32
    return %arg0, %c0_i32, %arg1 : i32, i32, i32
  }
  func.func @transform_3(%arg0: i32, %arg1: i32) -> (i32, i32, i32) {
    %c0_i32 = arith.constant 0 : i32
    %c0_i32_0 = arith.constant 0 : i32
    return %arg0, %c0_i32, %arg1 : i32, i32, i32
  }
}

</mosaic_0001>

<bundles_post_ra>
// kernel: patch_corr_attention.1
= control target key start
LH: loop header
LB: loop body
LE: loop exit
PB: predicated region body
PF: predicated region fallthrough
CT: control target
= control target key end

     0   :  { %8 = vsyncpa [#allocation3], 0  ;;  %s2365_s12 = smov 0   ;;  %s2367_s13 = smov 0   ;;  %s2941_s0 = inlined_call_operand.vmem [shape: f32[2], index: 0, kind: input, shape index: {}]   ;;  %s2942_s1 = inlined_call_operand.vmem [shape: bf16[4,9,384], index: 1, kind: input, shape index: {}, may-alias: {1,2}]   ;;  %s2943_s2 = inlined_call_operand.vmem [shape: bf16[4,9,384], index: 2, kind: input, shape index: {}, may-alias: {1,2}]   ;;  %s2944_s3 = inlined_call_operand.vmem [shape: f32[4,9,256], index: 3, kind: output, shape index: {}]  }
   0x1   :  { %s2369_s14 = smov 0   ;;  %s2371_s15 = smov 0  }
   0x2   :  { %s2373_s16 = smov 0  }
   0x3 LB: > { %s1978_s17 = sadd.s32 4294967295, %s2332_s16   ;;  %s26_s18 = sadd.s32 1, %s2328_s15  ;;  %s2332_s16 = sphi %s2373_s16, %s14_s16   ;;  %s2328_s15 = sphi %s2371_s15, %s2975_s15   ;;  %s2324_s14 = sphi %s2369_s14, %s2974_s14   ;;  %s2320_s13 = sphi %s2367_s13, %s2973_s13   ;;  %s2316_s12 = sphi %s2365_s12, %s2972_s12  }
   0x4   : > { %p28_p0 = scmp.ge.s32.totalorder %s26_s18, 2  ;;  %s82_s19 = sadd.s32 1, %s2320_s13 }
   0x5   : > { %p89_p1 = scmp.ne.s32.totalorder %s2320_s13, %s2316_s12  ;;  %p90_p2 = scmp.eq.s32.totalorder %s2332_s16, 0 }
   0x6   : > { %s2977_s18 = smov (%p28_p0, %s26_s18), 0  ;;  %p1980_p4 = scmp.ge.s32.totalorder %s2332_s16, 1 }
   0x7   : > { %p2398_p3 = por %p90_p2, %p89_p1  ;;  %s77_s21 = ssub.s32 %s2328_s15, %s2977_s18 }
   0x8   : > { %p134_p5 = scmp.lt.s32.totalorder %s2332_s16, 3  ;;  %p80_p6 = scmp.eq.s32.totalorder %s77_s21, 0 }
   0x9   : > { %p2410_p8 = scmp.eq.s32.totalorder %s1978_s17, 0  ;;  %s147_s27 = sshll.u32 %s2941_s0, 4  ;;  %s148_s27 = int_to_ptr.vmem [resolvable:$true] %s147_s27 }
   0xa   : > { %p2406_p7 = pnand %p1980_p4, %p134_p5  ;;  %s2255_s28 = scalar_lea.vmem %s148_s27, 16 }
   0xb   : > { %s2415_s24 = scalar_select %p80_p6, %s2320_s13, %s82_s19  }
   0xc   : > { %p2057_p9 = pneg %p2406_p7  ;;  %p2256_p11 = scmp.ne.s32.totalorder %s148_s27, %s2255_s28 }
   0xd   : > { %p2263_p1 = scmp.lt.s32.totalorder %s148_s27, %s148_s27  ;;  %p2264_p2 = scmp.lt.s32.totalorder %s2255_s28, %s2255_s28 }
   0xe   : > { %p2058_p10 = pnand %p2410_p8, %p2057_p9 }
   0xf   : > { %p2265_p4 = por %p2264_p2, %p2263_p1 }
  0x10   : > { %p2257_p12 = pneg %p2058_p10 }
  0x12   : > { %p2258_p13 = pnand %p2257_p12, %p2256_p11 }
  0x14   : > { %p2259_p0 = pneg %p2258_p13 }
  0x16   : > { %p2266_p5 = pnand %p2265_p4, %p2259_p0 }
  0x18   : > { %2269 = shalt.err (!%p2266_p5)
}
  0x19   : > { %s2342_s29 = smov [#allocation2]   ;;  %p1982_p6 = scmp.ge.s32.totalorder %s2332_s16, 2 }
  0x1a   : > { %2060 = dma.vmem_to_smem (!%p2058_p10), %s148_s27, 16, %s2342_s29, [#allocation3]  }
  0x1b   : > { %154 = sbr.rel (%p1982_p6) target bundleno = 45 (0x2d), region = 20 }
  0x20   : > { %167 = sbr.rel (!%p2398_p3) target bundleno = 45 (0x2d), region = 28  ;;  %s169_s30 = sand.u32 (%p2398_p3), 1, %s2320_s13  }
  0x21   : > { %s2051_s4 = smul.u32 (%p2398_p3), 48, %s2328_s15  ;;  %s1983_s5 = sshll.u32 (%p2398_p3), %s169_s30, 5 }
  0x22   : > { %s171_s9 = scalar_lea.vmem (%p2398_p3), [#allocation4], %s1983_s5   ;;  %s2334_s10 = smov (%p2398_p3), 0  }
  0x23   : > { %s182_s8 = scalar_lea.vmem (%p2398_p3), %s2943_s2, %s2051_s4  }
  0x25 LB: >> { %v385_v0 = vld [vmem:[%s182_s8] sm:$0xff]  ;;  %v387_v1 = vld [vmem:[%s182_s8 + $0xc] sm:$0xff]  ;;  %v389_v2 = vld [vmem:[%s182_s8 + $0x18] sm:$0xff]  ;;  %s379_s10 = sadd.s32 1, %s2336_s10   ;;  %s2336_s10 = sphi %s2334_s10, %s379_s10  }
  0x26   : >> { %386 = vst [vmem:[%s171_s9] sm:$0xff] %v385_v0  ;;  %388 = vst [vmem:[%s171_s9 + $0x8] sm:$0xff] %v387_v1  ;;  %v391_v3 = vld [vmem:[%s182_s8 + $0x24] sm:$0xff]  ;;  %p378_p3 = scmp.ge.s32.totalorder %s379_s10, 1 }
  0x27   : >> { %390 = vst [vmem:[%s171_s9 + $0x10] sm:$0xff] %v389_v2  ;;  %392 = vst [vmem:[%s171_s9 + $0x18] sm:$0xff] %v391_v3 }
  0x28   : > { %381 = sbr.rel (!%p378_p3) target bundleno = 37 (0x25), region = 180 }
  0x2d PF: > { %615 = sbr.rel (%p2406_p7) target bundleno = 745 (0x2e9), region = 94 }
  0x32   : > { %2311 = dma.done.wait (%p2410_p8), [#allocation3], 16  }
  0x33   : > { %2313 = vsyncadd (%p2410_p8), [#allocation3], 4294967280  ;;  %s622_s11 = sand.u32 1, %s2316_s12  }
  0x34   : > { %s2439_s17 = sshll.u32 %s622_s11, 5 }
  0x35   : > { %s624_s19 = scalar_lea.vmem [#allocation4], %s2439_s17 }
  0x36   : > { %628 = sfence }
  0x37   : > { %s2002_s20 = sshll.u32 %s2324_s14, 1  ;;  %s2443_s21 = sld [smem:[#allocation2]] }
  0x38   : > { %p658_p9 = scmp.lt.s32.totalorder %s2002_s20, 3  ;;  %s2445_s22 = sld [smem:[#allocation2 + $0x1]] }
  0x39   : > { %s2457_s4 = smov 0  }
  0x3a   : > { %s2979_s20 = smov (!%p658_p9, %s2002_s20), 3 }
  0x3b   : > { %s2052_s25 = smul.u32 24, %s2979_s20  ;;  %s2045_s26 = sshll.u32 %s2979_s20, 5 }
  0x3c   : > { %s2450_s28 = scalar_lea.vmem %s2944_s3, %s2045_s26 }
  0x3d   : > { %s2455_s30 = scalar_lea.vmem %s2942_s1, %s2052_s25 }
  0x3e LB: >> { %vm802_vm0 = vcmask 1043456   ;;  %vm803_vm1 = vcmask 1044480   ;;  %v2343_v4 = vmov 65535   ;;  %v2344_v6 = vmov 0   ;;  %s2046_s14 = smul.u32 24, %s2340_s4  ;;  %s2047_s5 = sshll.u32 %s2340_s4, 4  ;;  %s2340_s4 = sphi %s2457_s4, %s690_s4  }
  0x3f   : >> { %v804_v5 = vsel %vm802_vm0, 4294967295, %v2343_v4  ;;  %964 = vmatprep.mubr.bf16.mxu1 %v2344_v6  ;;  %844 = vmatprep.mubr.bf16.mxu0 %v2344_v6  ;;  %s700_s6 = scalar_lea.vmem %s624_s19, %s2047_s5 [#allocation4]  ;;  %vm753_vm2 = vcmask 72704   ;;  %v2535_v40 = vstv %s2443_s21  ;;  %s2048_s8 = sshll.u32 %s2340_s4, 5 }
  0x40   : >> { %v805_v7 = vsel %vm803_vm1, %v804_v5, 0  ;;  %s2469_s7 = scalar_lea.vmem %s2455_s30, %s2046_s14  ;;  %v2150_v8 = vld [vmem:[%s700_s6 + $0x4] ss:$8 sps:$4 sm:$0x1f]   ;;  %s1763_s9 = scalar_lea.vmem %s2450_s28, %s2048_s8 }
  0x41   : >> { %v2472_v9 = vld [vmem:[%s2469_s7 + $0x4] ss:$12 sps:$4 sm:$0x1f]   ;;  %v810_v10 = vand.u32 %v2150_v8, %v805_v7  ;;  %v2149_v11 = vld [vmem:[%s2469_s7 + $0x8] ss:$12 sps:$4 sm:$0x1f]  }
  0x42   : >> { %729 = vxpose.xlu0.c.b16.start.end [1/1] (short) %v2472_v9, 128  ;;  %v2152_v12 = vld [vmem:[%s700_s6] ss:$8 sps:$4 sm:$0x1f]   ;;  %1076 = vxpose.xlu1.c.b16.start.end [1/1] (short) %v2149_v11, 128  ;;  %s690_s4 = sadd.s32 1, %s2340_s4  }
  0x43   : >> { %2049 = vmatprep.subr.bf16.mxu1 %v810_v10  ;;  %826 = vmatprep.subr.bf16.mxu0 %v810_v10  ;;  %v807_v13 = vand.u32 %v2152_v12, %v805_v7  ;;  %v2148_v14 = vld [vmem:[%s2469_s7] ss:$12 sps:$4 sm:$0x1f]   ;;  %p687_p7 = scmp.ge.s32.totalorder %s690_s4, 2  }
  0x45   : >> { %2050 = vmatpush1.bf16.msra.mxu1 %v807_v13  ;;  %827 = vmatpush1.bf16.msra.mxu0 %v807_v13 }
  0x46   : >> { %1130 = vmatprep.subr.bf16.mxu1 %v810_v10 }
  0x5f   : >> { %713 = vxpose.xlu0.c.b16.start.end [1/1] (short) %v2148_v14, 128 }
  0xa4   : >> { %v737_v15 = vpop.trf.xlu0  ;;  %v1084_v25 = vpop.trf.xlu1 }
  0xa8   : >> { %v2477_v16 = vpop.trf.xlu0  ;;  %v1085_v27 = vpop.trf.xlu1 }
  0xac   : >> { %v2479_v17 = vpop.trf.xlu0  ;;  %v1086_v29 = vpop.trf.xlu1 }
  0xb0   : >> { %v2481_v18 = vpop.trf.xlu0  ;;  %v1087_v31 = vpop.trf.xlu1 }
  0xb4   : >> { %v741_v19 = vpop.trf.xlu0  ;;  %v1088_v33 = vpop.trf.xlu1 }
  0xb5   : >> { %2027 = vmatmul.mubr.msk.bf16.vlgmr.msra.gmra.mxu1 %vm753_vm2, %v741_v19 }
  0xb6   : >> { %974 = vmatprep.mubr.bf16.mxu1 %v2344_v6  ;;  %1131 = vmatpush1.bf16.msra.mxu1 %v807_v13 }
  0xb8   : >> { %v742_v20 = vpop.trf.xlu0  ;;  %v1089_v35 = vpop.trf.xlu1 }
  0xbc   : >> { %v743_v21 = vpop.trf.xlu0  ;;  %v1090_v37 = vpop.trf.xlu1 }
  0xbd   : >> { %2028 = vmatmul.mubr.msk.bf16.gmra.mxu1 %vm753_vm2, %v742_v20 }
  0xbe   : >> { %984 = vmatprep.mubr.bf16.mxu1 %v2344_v6 }
  0xc0   : >> { %v744_v22 = vpop.trf.xlu0  ;;  %v1091_v38 = vpop.trf.xlu1 }
  0xc4   : >> { %v721_v23 = vpop.trf.xlu0 }
  0xc5   : >> { %2015 = vmatmul.mubr.msk.bf16.vlgmr.msra.gmra.mxu0 %vm753_vm2, %v721_v23  ;;  %2029 = vmatmul.mubr.msk.bf16.gmra.mxu1 %vm753_vm2, %v743_v21 }
  0xc6   : >> { %854 = vmatprep.mubr.bf16.mxu0 %v2344_v6  ;;  %994 = vmatprep.mubr.bf16.mxu1 %v2344_v6 }
  0xc8   : >> { %v722_v24 = vpop.trf.xlu0 }
  0xcc   : >> { %v723_v26 = vpop.trf.xlu0 }
  0xcd   : >> { %2016 = vmatmul.mubr.msk.bf16.gmra.mxu0 %vm753_vm2, %v722_v24  ;;  %2030 = vmatmul.mubr.msk.bf16.gmra.mxu1 %vm753_vm2, %v744_v22 }
  0xce   : >> { %864 = vmatprep.mubr.bf16.mxu0 %v2344_v6  ;;  %1148 = vmatprep.mubr.bf16.mxu1 %v2344_v6 }
  0xd0   : >> { %v724_v28 = vpop.trf.xlu0 }
  0xd4   : >> { %v725_v30 = vpop.trf.xlu0 }
  0xd5   : >> { %2017 = vmatmul.mubr.msk.bf16.gmra.mxu0 %vm753_vm2, %v723_v26  ;;  %2032 = vmatmul.mubr.msk.bf16.vlgmr.msra.gmra.mxu1 %vm753_vm2, %v1084_v25 }
  0xd6   : >> { %874 = vmatprep.mubr.bf16.mxu0 %v2344_v6  ;;  %1158 = vmatprep.mubr.bf16.mxu1 %v2344_v6 }
  0xd8   : >> { %v726_v32 = vpop.trf.xlu0 }
  0xdc   : >> { %v727_v34 = vpop.trf.xlu0 }
  0xdd   : >> { %2018 = vmatmul.mubr.msk.bf16.gmra.mxu0 %vm753_vm2, %v724_v28  ;;  %2033 = vmatmul.mubr.msk.bf16.gmra.mxu1 %vm753_vm2, %v1085_v27 }
  0xde   : >> { %884 = vmatprep.mubr.bf16.mxu0 %v2344_v6  ;;  %1168 = vmatprep.mubr.bf16.mxu1 %v2344_v6 }
  0xe0   : >> { %v728_v36 = vpop.trf.xlu0 }
  0xe5   : >> { %2019 = vmatmul.mubr.msk.bf16.gmra.mxu0 %vm753_vm2, %v725_v30  ;;  %2034 = vmatmul.mubr.msk.bf16.gmra.mxu1 %vm753_vm2, %v1086_v29 }
  0xe6   : >> { %894 = vmatprep.mubr.bf16.mxu0 %v2344_v6  ;;  %1178 = vmatprep.mubr.bf16.mxu1 %v2344_v6 }
  0xed   : >> { %2020 = vmatmul.mubr.msk.bf16.gmra.mxu0 %vm753_vm2, %v726_v32  ;;  %2035 = vmatmul.mubr.msk.bf16.gmra.mxu1 %vm753_vm2, %v1087_v31 }
  0xee   : >> { %904 = vmatprep.mubr.bf16.mxu0 %v2344_v6  ;;  %1188 = vmatprep.mubr.bf16.mxu1 %v2344_v6 }
  0xf5   : >> { %2021 = vmatmul.mubr.msk.bf16.gmra.mxu0 %vm753_vm2, %v727_v34  ;;  %2036 = vmatmul.mubr.msk.bf16.gmra.mxu1 %vm753_vm2, %v1088_v33 }
  0xf6   : >> { %914 = vmatprep.mubr.bf16.mxu0 %v2344_v6  ;;  %1198 = vmatprep.mubr.bf16.mxu1 %v2344_v6 }
  0xfd   : >> { %2022 = vmatmul.mubr.msk.bf16.gmra.mxu0 %vm753_vm2, %v728_v36  ;;  %2037 = vmatmul.mubr.msk.bf16.gmra.mxu1 %vm753_vm2, %v1089_v35 }
  0xfe   : >> { %924 = vmatprep.mubr.bf16.mxu0 %v2344_v6  ;;  %1208 = vmatprep.mubr.bf16.mxu1 %v2344_v6 }
 0x105   : >> { %2023 = vmatmul.mubr.msk.bf16.gmra.mxu0 %vm753_vm2, %v737_v15  ;;  %2038 = vmatmul.mubr.msk.bf16.gmra.mxu1 %vm753_vm2, %v1090_v37 }
 0x106   : >> { %934 = vmatprep.mubr.bf16.mxu0 %v2344_v6  ;;  %1218 = vmatprep.mubr.bf16.mxu1 %v2344_v6 }
 0x10d   : >> { %2024 = vmatmul.mubr.msk.bf16.gmra.mxu0 %vm753_vm2, %v2477_v16  ;;  %2039 = vmatmul.mubr.msk.bf16.gmra.mxu1 %vm753_vm2, %v1091_v38  ;;  %v2608_v38 = vstv %s2445_s22 }
 0x10e   : >> { %944 = vmatprep.mubr.bf16.mxu0 %v2344_v6  ;;  %1702 = vmatprep.mubr.bf16.mxu1 %v2344_v6 }
 0x115   : >> { %2025 = vmatmul.mubr.msk.bf16.gmra.mxu0 %vm753_vm2, %v2479_v17 }
 0x116   : >> { %954 = vmatprep.mubr.bf16.mxu0 %v2344_v6 }
 0x11d   : >> { %2026 = vmatmul.mubr.msk.bf16.gmra.mxu0 %vm753_vm2, %v2481_v18 }
 0x11e   : >> { %1745 = vmatprep.mubr.bf16.mxu0 %v2472_v9 }
 0x175   : >> { %v966_v39 = vpop.f32.mrf.mxu1 }
 0x176   : >> { %v2538_v43 = vmul.f32 %v2535_v40, %v966_v39 }
 0x177   : >> { %v968_v41 = vpop.f32.mrf.mxu1 }
 0x178   : >> { %v2544_v46 = vmul.f32 %v2535_v40, %v968_v41 }
 0x179   : >> { %v970_v42 = vpop.f32.mrf.mxu1 }
 0x17a   : >> { %v2541_v44 = vmul.f32 %v2535_v40, %v970_v42 }
 0x17b   : >> { %v972_v45 = vpop.f32.mrf.mxu1 }
 0x17c   : >> { %v1286_v47 = vpack.c.bf16 %v2541_v44, %v2538_v43  ;;  %v2549_v48 = vmul.f32 %v2535_v40, %v972_v45 }
 0x17d   : >> { %v976_v49 = vpop.f32.mrf.mxu1 }
 0x17e   : >> { %v1287_v50 = vpack.c.bf16 %v2549_v48, %v2544_v46  ;;  %v2554_v53 = vmul.f32 %v2535_v40, %v976_v49 }
 0x17f   : >> { %v978_v51 = vpop.f32.mrf.mxu1 }
 0x180   : >> { %v2560_v56 = vmul.f32 %v2535_v40, %v978_v51 }
 0x181   : >> { %v980_v52 = vpop.f32.mrf.mxu1 }
 0x182   : >> { %v2557_v54 = vmul.f32 %v2535_v40, %v980_v52 }
 0x183   : >> { %v982_v55 = vpop.f32.mrf.mxu1 }
 0x184   : >> { %v1288_v57 = vpack.c.bf16 %v2557_v54, %v2554_v53  ;;  %v2565_v58 = vmul.f32 %v2535_v40, %v982_v55 }
 0x185   : >> { %v846_v59 = vpop.f32.mrf.mxu0  ;;  %v986_v60 = vpop.f32.mrf.mxu1 }
 0x186   : >> { %v1006_v2 = vmul.f32 %v2535_v40, %v846_v59  ;;  %v2571_v3 = vmul.f32 %v2535_v40, %v986_v60 }
 0x187   : >> { %v848_v62 = vpop.f32.mrf.mxu0  ;;  %v988_v63 = vpop.f32.mrf.mxu1 }
 0x188   : >> { %v1007_v6 = vmul.f32 %v2535_v40, %v848_v62  ;;  %v2579_v7 = vmul.f32 %v2535_v40, %v988_v63 }
 0x189   : >> { %v850_v0 = vpop.f32.mrf.mxu0  ;;  %v990_v1 = vpop.f32.mrf.mxu1 }
 0x18a   : >> { %v1008_v4 = vmul.f32 %v2535_v40, %v850_v0  ;;  %v2575_v5 = vmul.f32 %v2535_v40, %v990_v1 }
 0x18b   : >> { %v852_v8 = vpop.f32.mrf.mxu0  ;;  %v992_v9 = vpop.f32.mrf.mxu1 }
 0x18c   : >> { %v1262_v10 = vpack.c.bf16 %v1008_v4, %v1006_v2  ;;  %v1009_v12 = vmul.f32 %v2535_v40, %v852_v8  ;;  %v2585_v13 = vmul.f32 %v2535_v40, %v992_v9 }
 0x18d   : >> { %v856_v14 = vpop.f32.mrf.mxu0  ;;  %v996_v15 = vpop.f32.mrf.mxu1 }
 0x18e   : >> { %v1295_v16 = vmul.bf16 1069105081, %v1262_v10  ;;  %v1263_v17 = vpack.c.bf16 %v1009_v12, %v1007_v6  ;;  %v1010_v22 = vmul.f32 %v2535_v40, %v856_v14  ;;  %v2591_v25 = vmul.f32 %v2535_v40, %v996_v15 }
 0x18f   : >> { %v858_v19 = vpop.f32.mrf.mxu0  ;;  %v998_v20 = vpop.f32.mrf.mxu1 }
 0x190   : >> { %2153 = vpow.bf16 %v1295_v16  ;;  %v1298_v21 = vmul.bf16 1069105081, %v1263_v17  ;;  %v1011_v28 = vmul.f32 %v2535_v40, %v858_v19  ;;  %v2599_v29 = vmul.f32 %v2535_v40, %v998_v20 }
 0x191   : >> { %v860_v23 = vpop.f32.mrf.mxu0  ;;  %v1000_v24 = vpop.f32.mrf.mxu1 }
 0x192   : >> { %2155 = vpow.bf16 %v1298_v21  ;;  %v1012_v26 = vmul.f32 %v2535_v40, %v860_v23  ;;  %v2595_v27 = vmul.f32 %v2535_v40, %v1000_v24  ;;  %v1367_v21 = vmul.bf16 1069105081, %v1286_v47 }
 0x193   : >> { %v862_v30 = vpop.f32.mrf.mxu0  ;;  %v1002_v31 = vpop.f32.mrf.mxu1 }
 0x194   : >> { %v1264_v32 = vpack.c.bf16 %v1012_v26, %v1010_v22  ;;  %v1013_v34 = vmul.f32 %v2535_v40, %v862_v30  ;;  %v2605_v35 = vmul.f32 %v2535_v40, %v1002_v31 }
 0x195   : >> { %v866_v36 = vpop.f32.mrf.mxu0  ;;  %v1150_v37 = vpop.f32.mrf.mxu1 }
 0x196   : >> { %v1301_v39 = vmul.bf16 1069105081, %v1264_v32  ;;  %v1265_v41 = vpack.c.bf16 %v1013_v34, %v1011_v28  ;;  %v1230_v52 = vmul.f32 %v2608_v38, %v1150_v37  ;;  %v1014_v55 = vmul.f32 %v2535_v40, %v866_v36 }
 0x197   : >> { %v868_v45 = vpop.f32.mrf.mxu0  ;;  %v1152_v49 = vpop.f32.mrf.mxu1 }
 0x198   : >> { %2157 = vpow.bf16 %v1301_v39  ;;  %v1304_v51 = vmul.bf16 1069105081, %v1265_v41  ;;  %v1231_v62 = vmul.f32 %v2608_v38, %v1152_v49  ;;  %v1015_v1 = vmul.f32 %v2535_v40, %v868_v45 }
 0x199   : >> { %v870_v59 = vpop.f32.mrf.mxu0  ;;  %v1154_v60 = vpop.f32.mrf.mxu1 }
 0x19a   : >> { %2159 = vpow.bf16 %v1304_v51  ;;  %v1016_v63 = vmul.f32 %v2535_v40, %v870_v59  ;;  %v1232_v0 = vmul.f32 %v2608_v38, %v1154_v60 }
 0x19b   : >> { %v872_v2 = vpop.f32.mrf.mxu0  ;;  %v1156_v4 = vpop.f32.mrf.mxu1 }
 0x19c   : >> { %v1266_v6 = vpack.c.bf16 %v1016_v63, %v1014_v55  ;;  %v1390_v8 = vpack.c.bf16 %v1232_v0, %v1230_v52  ;;  %v1017_v9 = vmul.f32 %v2535_v40, %v872_v2  ;;  %v1233_v10 = vmul.f32 %v2608_v38, %v1156_v4 }
 0x19d   : >> { %v876_v12 = vpop.f32.mrf.mxu0  ;;  %v1160_v14 = vpop.f32.mrf.mxu1 }
 0x19e   : >> { %v2620_v15 = vpop.eup %2153  ;;  %v1307_v16 = vmul.bf16 1069105081, %v1266_v6  ;;  %v1407_v17 = vmul.bf16 1069105081, %v1390_v8  ;;  %v1267_v19 = vpack.c.bf16 %v1017_v9, %v1015_v1  ;;  %v1391_v20 = vpack.c.bf16 %v1233_v10, %v1231_v62 }
 0x19f   : >> { %v878_v22 = vpop.f32.mrf.mxu0  ;;  %v1162_v23 = vpop.f32.mrf.mxu1  ;;  %v1234_v30 = vmul.f32 %v2608_v38, %v1160_v14  ;;  %v1454_v31 = vunpack.c.l.bf16 %v2620_v15  ;;  %v1456_v32 = vunpack.c.h.bf16 %v2620_v15  ;;  %v1018_v34 = vmul.f32 %v2535_v40, %v876_v12 }
 0x1a0   : >> { %v2625_v24 = vpop.eup %2155  ;;  %2161 = vpow.bf16 %v1307_v16  ;;  %v1310_v26 = vmul.bf16 1069105081, %v1267_v19  ;;  %v1410_v28 = vmul.bf16 1069105081, %v1391_v20  ;;  %v1235_v43 = vmul.f32 %v2608_v38, %v1162_v23 }
 0x1a1   : >> { %2163 = vpow.bf16 %v1407_v17  ;;  %v880_v36 = vpop.f32.mrf.mxu0  ;;  %v1164_v37 = vpop.f32.mrf.mxu1  ;;  %v1455_v39 = vunpack.c.l.bf16 %v2625_v24  ;;  %v1457_v41 = vunpack.c.h.bf16 %v2625_v24  ;;  %v1019_v45 = vmul.f32 %v2535_v40, %v878_v22 }
 0x1a2   : >> { %2165 = vpow.bf16 %v1310_v26  ;;  %v1020_v44 = vmul.f32 %v2535_v40, %v880_v36  ;;  %v1236_v47 = vmul.f32 %v2608_v38, %v1164_v37  ;;  %v1370_v62 = vmul.bf16 1069105081, %v1287_v50 }
 0x1a3   : >> { %2167 = vpow.bf16 %v1410_v28  ;;  %v882_v49 = vpop.f32.mrf.mxu0  ;;  %v1166_v51 = vpop.f32.mrf.mxu1  ;;  %v1518_v9 = vadd.f32 %v1456_v32, %v1454_v31  ;;  %v1555_v10 = vadd.f32 %v1457_v41, %v1455_v39 }
 0x1a4   : >> { %v1268_v52 = vpack.c.bf16 %v1020_v44, %v1018_v34  ;;  %v1392_v55 = vpack.c.bf16 %v1236_v47, %v1234_v30  ;;  %v1021_v59 = vmul.f32 %v2535_v40, %v882_v49  ;;  %v1237_v60 = vmul.f32 %v2608_v38, %v1166_v51 }
 0x1a5   : >> { %2169 = vpow.bf16 %v1367_v21  ;;  %v886_v63 = vpop.f32.mrf.mxu0  ;;  %v1170_v0 = vpop.f32.mrf.mxu1 }
 0x1a6   : >> { %v2642_v1 = vpop.eup %2157  ;;  %v1313_v2 = vmul.bf16 1069105081, %v1268_v52  ;;  %v1413_v4 = vmul.bf16 1069105081, %v1392_v55  ;;  %v1269_v6 = vpack.c.bf16 %v1021_v59, %v1019_v45  ;;  %v1393_v8 = vpack.c.bf16 %v1237_v60, %v1235_v43 }
 0x1a7   : >> { %v1458_v12 = vunpack.c.l.bf16 %v2642_v1  ;;  %v1460_v14 = vunpack.c.h.bf16 %v2642_v1  ;;  %v888_v16 = vpop.f32.mrf.mxu0  ;;  %v1172_v17 = vpop.f32.mrf.mxu1  ;;  %v1238_v50 = vmul.f32 %v2608_v38, %v1170_v0  ;;  %v1022_v22 = vmul.f32 %v2535_v40, %v886_v63 }
 0x1a8   : >> { %v2646_v19 = vpop.eup %2159  ;;  %2171 = vpow.bf16 %v1313_v2  ;;  %v1316_v46 = vmul.bf16 1069105081, %v1269_v6  ;;  %v1416_v48 = vmul.bf16 1069105081, %v1393_v8  ;;  %v1023_v28 = vmul.f32 %v2535_v40, %v888_v16 }
 0x1a9   : >> { %v1519_v20 = vadd.f32 %v1518_v9, %v1458_v12  ;;  %v1459_v21 = vunpack.c.l.bf16 %v2646_v19  ;;  %2173 = vpow.bf16 %v1413_v4  ;;  %v890_v23 = vpop.f32.mrf.mxu0  ;;  %v1174_v26 = vpop.f32.mrf.mxu1  ;;  %v1461_v32 = vunpack.c.h.bf16 %v2646_v19 }
 0x1aa   : >> { %2175 = vpow.bf16 %v1316_v46  ;;  %v1024_v30 = vmul.f32 %v2535_v40, %v890_v23  ;;  %v1240_v31 = vmul.f32 %v2608_v38, %v1174_v26  ;;  %v1239_v36 = vmul.f32 %v2608_v38, %v1172_v17 }
 0x1ab   : >> { %v1556_v34 = vadd.f32 %v1555_v10, %v1459_v21  ;;  %2177 = vpow.bf16 %v1416_v48  ;;  %v892_v37 = vpop.f32.mrf.mxu0  ;;  %v1176_v43 = vpop.f32.mrf.mxu1  ;;  %v2661_v45 = vmul.bf16 1069105081, %v1288_v57  ;;  %v1520_v49 = vadd.f32 %v1519_v20, %v1460_v14 }
 0x1ac   : >> { %v1270_v44 = vpack.c.bf16 %v1024_v30, %v1022_v22  ;;  %v1394_v47 = vpack.c.bf16 %v1240_v31, %v1238_v50  ;;  %v1025_v39 = vmul.f32 %v2535_v40, %v892_v37  ;;  %v1241_v41 = vmul.f32 %v2608_v38, %v1176_v43 }
 0x1ad   : >> { %2179 = vpow.bf16 %v1370_v62  ;;  %v896_v51 = vpop.f32.mrf.mxu0  ;;  %v1180_v52 = vpop.f32.mrf.mxu1  ;;  %v1557_v59 = vadd.f32 %v1556_v34, %v1461_v32 }
 0x1ae   : >> { %v2663_v55 = vpop.eup %2161  ;;  %v1319_v60 = vmul.bf16 1069105081, %v1270_v44  ;;  %v1419_v63 = vmul.bf16 1069105081, %v1394_v47  ;;  %v1271_v0 = vpack.c.bf16 %v1025_v39, %v1023_v28  ;;  %v1395_v6 = vpack.c.bf16 %v1241_v41, %v1239_v36 }
 0x1af   : >> { %v2665_v2 = vpop.eup %2163  ;;  %v1462_v4 = vunpack.c.l.bf16 %v2663_v55  ;;  %v1464_v62 = vunpack.c.h.bf16 %v2663_v55  ;;  %v1026_v53 = vmul.f32 %v2535_v40, %v896_v51  ;;  %v898_v54 = vpop.f32.mrf.mxu0  ;;  %v1242_v46 = vmul.f32 %v2608_v38, %v1180_v52 }
 0x1b0   : >> { %2954 = vst [vmem:[#allocation6_spill] sm:$0xff] %v2665_v2  ;;  %v1182_v57 = vpop.f32.mrf.mxu1  ;;  %v2670_v8 = vpop.eup %2165  ;;  %v1592_v9 = vunpack.c.l.bf16 %v2665_v2  ;;  %v1594_v10 = vunpack.c.h.bf16 %v2665_v2  ;;  %2181 = vpow.bf16 %v1319_v60  ;;  %v1322_v12 = vmul.bf16 1069105081, %v1271_v0 }
 0x1b1   : >> { %v2674_v14 = vpop.eup %2167  ;;  %v1521_v16 = vadd.f32 %v1520_v49, %v1462_v4  ;;  %v1463_v17 = vunpack.c.l.bf16 %v2670_v8  ;;  %2183 = vpow.bf16 %v1419_v63  ;;  %v900_v48 = vpop.f32.mrf.mxu0  ;;  %v1465_v20 = vunpack.c.h.bf16 %v2670_v8 }
 0x1b2   : >> { %2955 = vst [vmem:[#allocation7_spill] sm:$0xff] %v2674_v14  ;;  %v1184_v50 = vpop.f32.mrf.mxu1  ;;  %v1593_v21 = vunpack.c.l.bf16 %v2674_v14  ;;  %v1595_v22 = vunpack.c.h.bf16 %v2674_v14  ;;  %2185 = vpow.bf16 %v1322_v12  ;;  %v1624_v28 = vadd.f32 %v1594_v10, %v1592_v9 }
 0x1b3   : >> { %v2681_v23 = vpop.eup %2169  ;;  %v1522_v26 = vadd.f32 %v1521_v16, %v1464_v62  ;;  %v1558_v30 = vadd.f32 %v1557_v59, %v1463_v17  ;;  %v1422_v31 = vmul.bf16 1069105081, %v1395_v6  ;;  %v902_v32 = vpop.f32.mrf.mxu0  ;;  %v1027_v36 = vmul.f32 %v2535_v40, %v898_v54 }
 0x1b4   : >> { %v1186_v34 = vpop.f32.mrf.mxu1  ;;  %v1243_v37 = vmul.f32 %v2608_v38, %v1182_v57  ;;  %v1028_v43 = vmul.f32 %v2535_v40, %v900_v48  ;;  %v1244_v44 = vmul.f32 %v2608_v38, %v1184_v50  ;;  %v1645_v47 = vadd.f32 %v1595_v22, %v1593_v21 }
 0x1b5   : >> { %2187 = vpow.bf16 %v1422_v31  ;;  %v1029_v39 = vmul.f32 %v2535_v40, %v902_v32  ;;  %v1245_v41 = vmul.f32 %v2608_v38, %v1186_v34  ;;  %v906_v49 = vpop.f32.mrf.mxu0  ;;  %v1559_v59 = vadd.f32 %v1558_v30, %v1465_v20 }
 0x1b6   : >> { %v1190_v51 = vpop.f32.mrf.mxu1  ;;  %v2689_v52 = vpop.eup %2171  ;;  %v1272_v60 = vpack.c.bf16 %v1028_v43, %v1026_v53  ;;  %v1396_v63 = vpack.c.bf16 %v1244_v44, %v1242_v46  ;;  %v1030_v0 = vmul.f32 %v2535_v40, %v906_v49 }
 0x1b7   : >> { %v2692_v4 = vpop.eup %2173  ;;  %v1466_v62 = vunpack.c.l.bf16 %v2689_v52  ;;  %v1273_v6 = vpack.c.bf16 %v1029_v39, %v1027_v36  ;;  %v1397_v54 = vpack.c.bf16 %v1245_v41, %v1243_v37  ;;  %v1246_v57 = vmul.f32 %v2608_v38, %v1190_v51  ;;  %v908_v9 = vpop.f32.mrf.mxu0 }
 0x1b8   : >> { %2956 = vst [vmem:[#allocation8_spill] sm:$0xff] %v2692_v4  ;;  %v1192_v10 = vpop.f32.mrf.mxu1  ;;  %v2696_v12 = vpop.eup %2175  ;;  %v1596_v16 = vunpack.c.l.bf16 %v2692_v4  ;;  %v1598_v17 = vunpack.c.h.bf16 %v2692_v4  ;;  %v1325_v53 = vmul.bf16 1069105081, %v1272_v60  ;;  %v1425_v46 = vmul.bf16 1069105081, %v1396_v63 }
 0x1b9   : >> { %v2700_v48 = vpop.eup %2177  ;;  %v1468_v50 = vunpack.c.h.bf16 %v2689_v52  ;;  %v1523_v20 = vadd.f32 %v1522_v26, %v1466_v62  ;;  %v1467_v21 = vunpack.c.l.bf16 %v2696_v12  ;;  %v1328_v22 = vmul.bf16 1069105081, %v1273_v6  ;;  %v910_v30 = vpop.f32.mrf.mxu0 }
 0x1ba   : >> { %2957 = vst [vmem:[#allocation9_spill] sm:$0xff] %v2700_v48  ;;  %v1194_v31 = vpop.f32.mrf.mxu1  ;;  %v1625_v32 = vadd.f32 %v1624_v28, %v1596_v16  ;;  %v1469_v34 = vunpack.c.h.bf16 %v2696_v12  ;;  %v1597_v36 = vunpack.c.l.bf16 %v2700_v48  ;;  %2189 = vpow.bf16 %v1325_v53 }
 0x1bb   : >> { %v2706_v37 = vpop.eup %2179  ;;  %v1560_v43 = vadd.f32 %v1559_v59, %v1467_v21  ;;  %v1599_v44 = vunpack.c.h.bf16 %v2700_v48  ;;  %2191 = vpow.bf16 %v1425_v46  ;;  %v1428_v39 = vmul.bf16 1069105081, %v1397_v54  ;;  %v912_v41 = vpop.f32.mrf.mxu0 }
 0x1bc   : >> { %v1196_v26 = vpop.f32.mrf.mxu1  ;;  %v1524_v49 = vadd.f32 %v1523_v20, %v1468_v50  ;;  %v1626_v51 = vadd.f32 %v1625_v32, %v1598_v17  ;;  %v1646_v60 = vadd.f32 %v1645_v47, %v1597_v36  ;;  %2193 = vpow.bf16 %v1328_v22 }
 0x1bd   : >> { %v1561_v63 = vadd.f32 %v1560_v43, %v1469_v34  ;;  %2195 = vpow.bf16 %v1428_v39  ;;  %v1031_v28 = vmul.f32 %v2535_v40, %v908_v9  ;;  %v1032_v62 = vmul.f32 %v2535_v40, %v910_v30  ;;  %v916_v6 = vpop.f32.mrf.mxu0 }
 0x1be   : >> { %v1200_v16 = vpop.f32.mrf.mxu1  ;;  %v2711_v53 = vpop.eup %2181  ;;  %v1247_v59 = vmul.f32 %v2608_v38, %v1192_v10  ;;  %v1248_v54 = vmul.f32 %v2608_v38, %v1194_v31  ;;  %v1033_v46 = vmul.f32 %v2535_v40, %v912_v41  ;;  %v1249_v17 = vmul.f32 %v2608_v38, %v1196_v26 }
 0x1bf   : >> { %v2717_v47 = vpop.eup %2183  ;;  %v1647_v50 = vadd.f32 %v1646_v60, %v1599_v44  ;;  %v1470_v20 = vunpack.c.l.bf16 %v2711_v53  ;;  %v1472_v9 = vunpack.c.h.bf16 %v2711_v53  ;;  %v1274_v21 = vpack.c.bf16 %v1032_v62, %v1030_v0  ;;  %v918_v22 = vpop.f32.mrf.mxu0 }
 0x1c0   : >> { %2958 = vst [vmem:[#allocation10_spill] sm:$0xff] %v2717_v47  ;;  %v1202_v30 = vpop.f32.mrf.mxu1  ;;  %v2721_v32 = vpop.eup %2185  ;;  %v1600_v10 = vunpack.c.l.bf16 %v2717_v47  ;;  %v1398_v34 = vpack.c.bf16 %v1248_v54, %v1246_v57  ;;  %v1275_v31 = vpack.c.bf16 %v1033_v46, %v1031_v28  ;;  %v1034_v36 = vmul.f32 %v2535_v40, %v916_v6 }
 0x1c1   : >> { %v1525_v43 = vadd.f32 %v1524_v49, %v1470_v20  ;;  %v1602_v39 = vunpack.c.h.bf16 %v2717_v47  ;;  %v1471_v44 = vunpack.c.l.bf16 %v2721_v32  ;;  %v1331_v41 = vmul.bf16 1069105081, %v1274_v21  ;;  %v920_v26 = vpop.f32.mrf.mxu0 }
 0x1c2   : >> { %v1204_v60 = vpop.f32.mrf.mxu1  ;;  %v1627_v11 = vadd.f32 %v1626_v51, %v1600_v10  ;;  %v1431_v0 = vmul.bf16 1069105081, %v1398_v34  ;;  %v1334_v62 = vmul.bf16 1069105081, %v1275_v31  ;;  %v1399_v33 = vpack.c.bf16 %v1249_v17, %v1247_v59 }
 0x1c3   : >> { %v2727_v18 = vpop.eup %2187  ;;  %v1526_v42 = vadd.f32 %v1525_v43, %v1472_v9  ;;  %v1473_v57 = vunpack.c.h.bf16 %v2721_v32  ;;  %v1562_v28 = vadd.f32 %v1561_v63, %v1471_v44  ;;  %2197 = vpow.bf16 %v1331_v41  ;;  %v922_v6 = vpop.f32.mrf.mxu0 }
 0x1c4   : >> { %2959 = vst [vmem:[#allocation11_spill] sm:$0xff] %v2727_v18  ;;  %v1206_v49 = vpop.f32.mrf.mxu1  ;;  %v1601_v54 = vunpack.c.l.bf16 %v2727_v18  ;;  %v1603_v46 = vunpack.c.h.bf16 %v2727_v18  ;;  %2199 = vpow.bf16 %v1431_v0  ;;  %v1250_v20 = vmul.f32 %v2608_v38, %v1200_v16 }
 0x1c5   : >> { %v1628_v51 = vadd.f32 %v1627_v11, %v1602_v39  ;;  %v1563_v21 = vadd.f32 %v1562_v28, %v1473_v57  ;;  %2201 = vpow.bf16 %v1334_v62  ;;  %v1434_v59 = vmul.bf16 1069105081, %v1399_v33  ;;  %v926_v17 = vpop.f32.mrf.mxu0 }
 0x1c6   : >> { %v1210_v10 = vpop.f32.mrf.mxu1  ;;  %v1648_v9 = vadd.f32 %v1647_v50, %v1601_v54  ;;  %v1251_v34 = vmul.f32 %v2608_v38, %v1202_v30  ;;  %v1036_v63 = vmul.f32 %v2535_v40, %v920_v26  ;;  %v1252_v31 = vmul.f32 %v2608_v38, %v1204_v60 }
 0x1c7   : >> { %2203 = vpow.bf16 %v1434_v59  ;;  %v1035_v43 = vmul.f32 %v2535_v40, %v918_v22  ;;  %v1037_v44 = vmul.f32 %v2535_v40, %v922_v6  ;;  %v1253_v16 = vmul.f32 %v2608_v38, %v1206_v49  ;;  %v928_v11 = vpop.f32.mrf.mxu0 }
 0x1c8   : >> { %v1212_v39 = vpop.f32.mrf.mxu1  ;;  %v2739_v41 = vpop.eup %2189  ;;  %v1649_v33 = vadd.f32 %v1648_v9, %v1603_v46  ;;  %v1276_v0 = vpack.c.bf16 %v1036_v63, %v1034_v36  ;;  %v1400_v50 = vpack.c.bf16 %v1252_v31, %v1250_v20  ;;  %v1038_v30 = vmul.f32 %v2535_v40, %v926_v17 }
 0x1c9   : >> { %v2742_v62 = vpop.eup %2191  ;;  %v1474_v26 = vunpack.c.l.bf16 %v2739_v41  ;;  %v1476_v60 = vunpack.c.h.bf16 %v2739_v41  ;;  %v1277_v22 = vpack.c.bf16 %v1037_v44, %v1035_v43  ;;  %v1401_v57 = vpack.c.bf16 %v1253_v16, %v1251_v34  ;;  %v930_v28 = vpop.f32.mrf.mxu0 }
 0x1ca   : >> { %v1214_v6 = vpop.f32.mrf.mxu1  ;;  %v2746_v49 = vpop.eup %2193  ;;  %v1604_v54 = vunpack.c.l.bf16 %v2742_v62  ;;  %v1606_v46 = vunpack.c.h.bf16 %v2742_v62  ;;  %v1337_v36 = vmul.bf16 1069105081, %v1276_v0  ;;  %v1437_v20 = vmul.bf16 1069105081, %v1400_v50 }
 0x1cb   : >> { %v2750_v59 = vpop.eup %2195  ;;  %v1527_v17 = vadd.f32 %v1526_v42, %v1474_v26  ;;  %v1475_v9 = vunpack.c.l.bf16 %v2746_v49  ;;  %v1477_v63 = vunpack.c.h.bf16 %v2746_v49  ;;  %v1340_v31 = vmul.bf16 1069105081, %v1277_v22  ;;  %v932_v43 = vpop.f32.mrf.mxu0 }
 0x1cc   : >> { %v1216_v34 = vpop.f32.mrf.mxu1  ;;  %v1629_v44 = vadd.f32 %v1628_v51, %v1604_v54  ;;  %v1605_v16 = vunpack.c.l.bf16 %v2750_v59  ;;  %v1607_v61 = vunpack.c.h.bf16 %v2750_v59  ;;  %2205 = vpow.bf16 %v1337_v36 }
 0x1cd   : >> { %v1528_v2 = vadd.f32 %v1527_v17, %v1476_v60  ;;  %v1564_v14 = vadd.f32 %v1563_v21, %v1475_v9  ;;  %2207 = vpow.bf16 %v1437_v20  ;;  %v1440_v0 = vmul.bf16 1069105081, %v1401_v57  ;;  %v936_v50 = vpop.f32.mrf.mxu0 }
 0x1ce   : >> { %v1220_v4 = vpop.f32.mrf.mxu1  ;;  %v1650_v42 = vadd.f32 %v1649_v33, %v1605_v16  ;;  %2209 = vpow.bf16 %v1340_v31  ;;  %v1254_v26 = vmul.f32 %v2608_v38, %v1210_v10  ;;  %v1039_v22 = vmul.f32 %v2535_v40, %v928_v11 }
 0x1cf   : >> { %v1565_v48 = vadd.f32 %v1564_v14, %v1477_v63  ;;  %2211 = vpow.bf16 %v1440_v0  ;;  %v1255_v51 = vmul.f32 %v2608_v38, %v1212_v39  ;;  %v1040_v54 = vmul.f32 %v2535_v40, %v930_v28  ;;  %v938_v47 = vpop.f32.mrf.mxu0 }
 0x1d0   : >> { %v1222_v36 = vpop.f32.mrf.mxu1  ;;  %v1651_v60 = vadd.f32 %v1650_v42, %v1607_v61  ;;  %v1256_v21 = vmul.f32 %v2608_v38, %v1214_v6  ;;  %v1041_v57 = vmul.f32 %v2535_v40, %v932_v43  ;;  %v1257_v33 = vmul.f32 %v2608_v38, %v1216_v34 }
 0x1d1   : >> { %v2763_v20 = vpop.eup %2197  ;;  %v1630_v10 = vadd.f32 %v1629_v44, %v1606_v46  ;;  %v1278_v17 = vpack.c.bf16 %v1040_v54, %v1038_v30  ;;  %v1042_v14 = vmul.f32 %v2535_v40, %v936_v50  ;;  %v1258_v11 = vmul.f32 %v2608_v38, %v1220_v4  ;;  %v940_v39 = vpop.f32.mrf.mxu0 }
 0x1d2   : >> { %v2767_v9 = vpop.eup %2199  ;;  %v1478_v28 = vunpack.c.l.bf16 %v2763_v20  ;;  %v1402_v61 = vpack.c.bf16 %v1256_v21, %v1254_v26  ;;  %v1279_v63 = vpack.c.bf16 %v1041_v57, %v1039_v22  ;;  %v1043_v6 = vmul.f32 %v2535_v40, %v938_v47  ;;  %v1224_v31 = vpop.f32.mrf.mxu1 }
 0x1d3   : >> { %v2771_v43 = vpop.eup %2201  ;;  %v1480_v34 = vunpack.c.h.bf16 %v2763_v20  ;;  %v1608_v30 = vunpack.c.l.bf16 %v2767_v9  ;;  %v1343_v46 = vmul.bf16 1069105081, %v1278_v17  ;;  %v1403_v44 = vpack.c.bf16 %v1257_v33, %v1255_v51  ;;  %v942_v16 = vpop.f32.mrf.mxu0 }
 0x1d4   : >> { %v1529_v4 = vadd.f32 %v1528_v2, %v1478_v28  ;;  %v1479_v50 = vunpack.c.l.bf16 %v2771_v43  ;;  %v1443_v42 = vmul.bf16 1069105081, %v1402_v61  ;;  %v1346_v47 = vmul.bf16 1069105081, %v1279_v63  ;;  %v1226_v2 = vpop.f32.mrf.mxu1 }
 0x1d5   : >> { %v2777_v26 = vpop.eup %2203  ;;  %v2779_v22 = vadd.f32 %v1630_v10, %v1608_v30  ;;  %2213 = vpow.bf16 %v1343_v46  ;;  %v1446_v54 = vmul.bf16 1069105081, %v1403_v44  ;;  %v946_v21 = vpop.f32.mrf.mxu0  ;;  %v1481_v18 = vunpack.c.h.bf16 %v2771_v43 }
 0x1d6   : >> { %v1530_v57 = vadd.f32 %v1529_v4, %v1480_v34  ;;  %v1566_v17 = vadd.f32 %v1565_v48, %v1479_v50  ;;  %v1609_v51 = vunpack.c.l.bf16 %v2777_v26  ;;  %2215 = vpow.bf16 %v1443_v42 }
 0x1d7   : >> { %v1259_v33 = vmul.f32 %v2608_v38, %v1222_v36  ;;  %v1044_v28 = vmul.f32 %v2535_v40, %v940_v39  ;;  %v1260_v61 = vmul.f32 %v2608_v38, %v1224_v31  ;;  %v948_v10 = vpop.f32.mrf.mxu0  ;;  %2217 = vpow.bf16 %v1346_v47 }
 0x1d8   : >> { %v1567_v30 = vadd.f32 %v1566_v17, %v1481_v18  ;;  %v1652_v46 = vadd.f32 %v1651_v60, %v1609_v51  ;;  %v1045_v63 = vmul.f32 %v2535_v40, %v942_v16  ;;  %2219 = vpow.bf16 %v1446_v54 }
 0x1d9   : >> { %v1280_v34 = vpack.c.bf16 %v1044_v28, %v1042_v14  ;;  %v1404_v44 = vpack.c.bf16 %v1260_v61, %v1258_v11  ;;  %v1261_v48 = vmul.f32 %v2608_v38, %v1226_v2  ;;  %v950_v4 = vpop.f32.mrf.mxu0  ;;  %v1611_v42 = vunpack.c.h.bf16 %v2777_v26 }
 0x1da   : >> { %v2206_v50 = vpop.eup %2205  ;;  %v1281_v36 = vpack.c.bf16 %v1045_v63, %v1043_v6  ;;  %v1046_v39 = vmul.f32 %v2535_v40, %v946_v21  ;;  %v1048_v31 = vmul.f32 %v2535_v40, %v950_v4  ;;  %v1047_v16 = vmul.f32 %v2535_v40, %v948_v10 }
 0x1db   : >> { %v2791_v0 = vpop.eup %2207  ;;  %v1482_v18 = vunpack.c.l.bf16 %v2206_v50  ;;  %v1349_v60 = vmul.bf16 1069105081, %v1280_v34  ;;  %v1449_v47 = vmul.bf16 1069105081, %v1404_v44  ;;  %v952_v14 = vpop.f32.mrf.mxu0  ;;  %v1484_v54 = vunpack.c.h.bf16 %v2206_v50 }
 0x1dc   : >> { %v2210_v11 = vpop.eup %2209  ;;  %v1352_v38 = vmul.bf16 1069105081, %v1281_v36  ;;  %v1405_v17 = vpack.c.bf16 %v1261_v48, %v1259_v33  ;;  %v1282_v51 = vpack.c.bf16 %v1048_v31, %v1046_v39  ;;  %v1612_v21 = vunpack.c.l.bf16 %v2791_v0 }
 0x1dd   : >> { %v2794_v2 = vpop.eup %2211  ;;  %v1531_v6 = vadd.f32 %v1530_v57, %v1482_v18  ;;  %v1483_v28 = vunpack.c.l.bf16 %v2210_v11  ;;  %2221 = vpow.bf16 %v1349_v60  ;;  %1713 = vmatprep.subr.bf16.mxu0 %v2210_v11  ;;  %v956_v61 = vpop.f32.mrf.mxu0  ;;  %v1485_v63 = vunpack.c.h.bf16 %v2210_v11 }
 0x1de   : >> { %2223 = vpow.bf16 %v1449_v47  ;;  %v1452_v34 = vmul.bf16 1069105081, %v1405_v17  ;;  %v1355_v44 = vmul.bf16 1069105081, %v1282_v51  ;;  %1714 = vmatpush1.bf16.msra.mxu0 %v2206_v50  ;;  %v1049_v33 = vmul.f32 %v2535_v40, %v952_v14 }
 0x1df   : >> { %v1532_v10 = vadd.f32 %v1531_v6, %v1484_v54  ;;  %v1568_v4 = vadd.f32 %v1567_v30, %v1483_v28  ;;  %2225 = vpow.bf16 %v1352_v38  ;;  %1715 = vmatprep.subr.bf16.mxu0 %v2771_v43  ;;  %v958_v48 = vpop.f32.mrf.mxu0  ;;  %v1613_v57 = vunpack.c.l.bf16 %v2794_v2 }
 0x1e0   : >> { %2227 = vpow.bf16 %v1452_v34  ;;  %v1614_v36 = vunpack.c.h.bf16 %v2791_v0  ;;  %v1283_v31 = vpack.c.bf16 %v1049_v33, %v1047_v16  ;;  %v2960_v60 = vunpack.c.h.bf16 %v2767_v9 }
 0x1e1   : >> { %v1569_v39 = vadd.f32 %v1568_v4, %v1485_v63  ;;  %2229 = vpow.bf16 %v1355_v44  ;;  %v960_v18 = vpop.f32.mrf.mxu0  ;;  %v1050_v30 = vmul.f32 %v2535_v40, %v956_v61  ;;  %v1653_v47 = vadd.f32 %v1652_v46, %v1611_v42 }
 0x1e2   : >> { %v1632_v50 = vadd.f32 %v2779_v22, %v2960_v60  ;;  %2231 = vpow.bf16 %v2661_v45  ;;  %1716 = vmatpush1.bf16.msra.mxu0 %v2763_v20  ;;  %v1052_v43 = vmul.f32 %v2535_v40, %v960_v18  ;;  %v2961_v11 = vpack.c.bf16 %v2565_v58, %v2560_v56 }
 0x1e3   : >> { %v2808_v14 = vpop.eup %2213  ;;  %v1358_v54 = vmul.bf16 1069105081, %v1283_v31  ;;  %1717 = vmatprep.subr.bf16.mxu0 %v2746_v49  ;;  %v962_v38 = vpop.f32.mrf.mxu0  ;;  %v1615_v45 = vunpack.c.h.bf16 %v2794_v2  ;;  %v1051_v20 = vmul.f32 %v2535_v40, %v958_v48  ;;  %v1654_v58 = vadd.f32 %v1653_v47, %v1613_v57 }
 0x1e4   : >> { %v1376_v16 = vmul.bf16 1069105081, %v2961_v11  ;;  %v1633_v22 = vadd.f32 %v1632_v50, %v1612_v21  ;;  %v1486_v17 = vunpack.c.l.bf16 %v2808_v14  ;;  %v1284_v51 = vpack.c.bf16 %v1052_v43, %v1050_v30  ;;  %v2818_v42 = vpop.eup %2215 }
 0x1e5   : >> { %v1053_v46 = vmul.f32 %v2535_v40, %v962_v38  ;;  %v1488_v6 = vunpack.c.h.bf16 %v2808_v14  ;;  %2233 = vpow.bf16 %v1358_v54  ;;  %v2821_v28 = vpop.eup %2217  ;;  %v1616_v63 = vunpack.c.l.bf16 %v2818_v42 }
 0x1e6   : >> { %v1634_v56 = vadd.f32 %v1633_v22, %v1614_v36  ;;  %v1533_v49 = vadd.f32 %v1532_v10, %v1486_v17  ;;  %v1361_v21 = vmul.bf16 1069105081, %v1284_v51  ;;  %1718 = vmatpush1.bf16.msra.mxu0 %v2739_v41  ;;  %v2220_v34 = vpop.eup %2219  ;;  %v2962_v40 = vpack.c.bf16 %v2605_v35, %v2599_v29 }
 0x1e7   : >> { %v1285_v61 = vpack.c.bf16 %v1053_v46, %v1051_v20  ;;  %v1487_v4 = vunpack.c.l.bf16 %v2821_v28  ;;  %1719 = vmatprep.subr.bf16.mxu0 %v2721_v32  ;;  %v1618_v33 = vunpack.c.h.bf16 %v2818_v42  ;;  %v1655_v48 = vadd.f32 %v1654_v58, %v1615_v45 }
 0x1e8   : >> { %v1388_v44 = vmul.bf16 1069105081, %v2962_v40  ;;  %v1534_v57 = vadd.f32 %v1533_v49, %v1488_v6  ;;  %2235 = vpow.bf16 %v1361_v21  ;;  %v1635_v36 = vadd.f32 %v1634_v56, %v1616_v63 }
 0x1e9   : >> { %v1364_v10 = vmul.bf16 1069105081, %v1285_v61  ;;  %v1489_v41 = vunpack.c.h.bf16 %v2821_v28  ;;  %v1570_v31 = vadd.f32 %v1569_v39, %v1487_v4  ;;  %v1617_v18 = vunpack.c.l.bf16 %v2220_v34 }
 0x1ea   : >> { %v1619_v60 = vunpack.c.h.bf16 %v2220_v34  ;;  %v2963_v29 = vpack.c.bf16 %v2585_v13, %v2579_v7  ;;  %1720 = vmatpush1.bf16.msra.mxu0 %v2711_v53  ;;  %v1636_v32 = vadd.f32 %v1635_v36, %v1618_v33  ;;  %v2964_v30 = vpack.c.bf16 %v2595_v27, %v2591_v25 }
 0x1eb   : >> { %2237 = vpow.bf16 %v1364_v10  ;;  %v2836_v50 = vpop.eup %2221  ;;  %v1571_v47 = vadd.f32 %v1570_v31, %v1489_v41  ;;  %1721 = vmatprep.subr.bf16.mxu0 %v2696_v12  ;;  %v1656_v39 = vadd.f32 %v1655_v48, %v1617_v18  ;;  %v2965_v53 = vpack.c.bf16 %v2575_v5, %v2571_v3 }
 0x1ec   : >> { %v1382_v35 = vmul.bf16 1069105081, %v2963_v29  ;;  %2239 = vpow.bf16 %v1376_v16  ;;  %v1385_v43 = vmul.bf16 1069105081, %v2964_v30  ;;  %v2224_v11 = vpop.eup %2223  ;;  %v1490_v7 = vunpack.c.l.bf16 %v2836_v50 }
 0x1ed   : >> { %2241 = vpow.bf16 %v1388_v44  ;;  %v2843_v13 = vpop.eup %2225  ;;  %v1379_v54 = vmul.bf16 1069105081, %v2965_v53  ;;  %v1620_v38 = vunpack.c.l.bf16 %v2224_v11  ;;  %v1622_v16 = vunpack.c.h.bf16 %v2224_v11 }
 0x1ee   : >> { %v1657_v22 = vadd.f32 %v1656_v39, %v1619_v60  ;;  %v2228_v45 = vpop.eup %2227  ;;  %2243 = vpow.bf16 %v1382_v35  ;;  %v1492_v25 = vunpack.c.h.bf16 %v2836_v50  ;;  %v1535_v27 = vadd.f32 %v1534_v57, %v1490_v7  ;;  %1722 = vmatpush1.bf16.msra.mxu0 %v2689_v52 }
 0x1ef   : >> { %v1491_v12 = vunpack.c.l.bf16 %v2843_v13  ;;  %v2851_v17 = vpop.eup %2229  ;;  %2245 = vpow.bf16 %v1385_v43  ;;  %1670 = vmatprep.subr.bf16.mxu1 %v2228_v45  ;;  %1723 = vmatprep.subr.bf16.mxu0 %v2670_v8  ;;  %v1637_v3 = vadd.f32 %v1636_v32, %v1620_v38  ;;  %v1621_v5 = vunpack.c.l.bf16 %v2228_v45 }
 0x1f0   : >> { %v1623_v20 = vunpack.c.h.bf16 %v2228_v45  ;;  %v2854_v51 = vpop.eup %2231  ;;  %v1536_v46 = vadd.f32 %v1535_v27, %v1492_v25  ;;  %v1493_v6 = vunpack.c.h.bf16 %v2843_v13  ;;  %v1494_v58 = vunpack.c.l.bf16 %v2851_v17  ;;  %1671 = vmatpush1.bf16.msra.mxu1 %v2224_v11  ;;  %v2966_v11 = vld [vmem:[#allocation11_spill] sm:$0xff]  ;;  %v2967_v25 = vld [vmem:[#allocation10_spill] sm:$0xff] }
 0x1f1   : >> { %v1572_v56 = vadd.f32 %v1571_v47, %v1491_v12  ;;  %1672 = vmatprep.subr.bf16.mxu1 %v2220_v34  ;;  %v2858_v52 = vadd.f32 %v1637_v3, %v1622_v16  ;;  %v1658_v49 = vadd.f32 %v1657_v22, %v1621_v5  ;;  %2247 = vpow.bf16 %v1379_v54  ;;  %v2968_v12 = vld [vmem:[#allocation9_spill] sm:$0xff] }
 0x1f2   : >> { %v1496_v8 = vunpack.c.h.bf16 %v2851_v17  ;;  %v1537_v61 = vadd.f32 %v1536_v46, %v1494_v58  ;;  %1724 = vmatpush1.bf16.msra.mxu0 %v2663_v55  ;;  %v1504_v29 = vunpack.c.h.bf16 %v2681_v23  ;;  %v1505_v32 = vunpack.c.h.bf16 %v2706_v37 }
 0x1f3   : >> { %v1573_v21 = vadd.f32 %v1572_v56, %v1493_v6  ;;  %v2862_v63 = vpop.eup %2233  ;;  %1725 = vmatprep.subr.bf16.mxu0 %v2646_v19  ;;  %v2865_v40 = vadd.f32 %v1658_v49, %v1623_v20  ;;  %v1506_v30 = vunpack.c.l.bf16 %v2854_v51  ;;  %v1508_v7 = vunpack.c.h.bf16 %v2854_v51 }
 0x1f4   : >> { %v1538_v44 = vadd.f32 %v1537_v61, %v1496_v8  ;;  %v1495_v4 = vunpack.c.l.bf16 %v2862_v63  ;;  %1673 = vmatpush1.bf16.msra.mxu1 %v2818_v42  ;;  %v1497_v33 = vunpack.c.h.bf16 %v2862_v63  ;;  %v1639_v22 = vrot.slane %v2858_v52, 4  ;;  %v2970_v61 = vld [vmem:[#allocation7_spill] sm:$0xff] }
 0x1f5   : >> { %1674 = vmatprep.subr.bf16.mxu1 %v2794_v2  ;;  %v1660_v20 = vrot.slane %v2865_v40, 4 }
 0x1f6   : >> { %v2870_v34 = vpop.eup %2235  ;;  %v1574_v48 = vadd.f32 %v1573_v21, %v1495_v4  ;;  %1726 = vmatpush1.bf16.msra.mxu0 %v2642_v1  ;;  %v1502_v1 = vunpack.c.l.bf16 %v2681_v23  ;;  %v1640_v58 = vadd.f32 %v1639_v22, %v2858_v52  ;;  %v2969_v21 = vld [vmem:[#allocation8_spill] sm:$0xff] }
 0x1f7   : >> { %v1498_v55 = vunpack.c.l.bf16 %v2870_v34  ;;  %1727 = vmatprep.subr.bf16.mxu0 %v2625_v24  ;;  %v1500_v42 = vunpack.c.h.bf16 %v2870_v34 }
 0x1f8   : >> { %v1575_v57 = vadd.f32 %v1574_v48, %v1497_v33  ;;  %1675 = vmatpush1.bf16.msra.mxu1 %v2791_v0  ;;  %v1641_v48 = vrot.slane %v1640_v58, 2 }
 0x1f9   : >> { %v2876_v19 = vpop.eup %2237  ;;  %v1539_v2 = vadd.f32 %v1538_v44, %v1498_v55  ;;  %1676 = vmatprep.subr.bf16.mxu1 %v2777_v26  ;;  %v1503_v26 = vunpack.c.l.bf16 %v2706_v37 }
 0x1fa   : >> { %v2240_v10 = vpop.eup %2239  ;;  %v1499_v36 = vunpack.c.l.bf16 %v2876_v19  ;;  %1728 = vmatpush1.bf16.msra.mxu0 %v2620_v15  ;;  %v1501_v31 = vunpack.c.h.bf16 %v2876_v19 }
 0x1fb   : >> { %v2882_v41 = vpop.eup %2241  ;;  %v1540_v24 = vadd.f32 %v1539_v2, %v1500_v42 }
 0x1fc   : >> { %v1576_v18 = vadd.f32 %v1575_v57, %v1499_v36  ;;  %1729 = vmatprep.subr.bf16.mxu0 %v2882_v41  ;;  %v2244_v0 = vpop.eup %2243  ;;  %1677 = vmatpush1.bf16.msra.mxu1 %v2767_v9  ;;  %v1507_v9 = vunpack.c.l.bf16 %v2240_v10  ;;  %v1515_v4 = vunpack.c.l.bf16 %v2882_v41  ;;  %v1517_v52 = vunpack.c.h.bf16 %v2882_v41  ;;  %v2971_v57 = vld [vmem:[#allocation6_spill] sm:$0xff]  ;;  %v2253_v36 = vld [vmem:[%s2469_s7 + $0x8] ss:$12 sps:$4 sm:$0x1f]  }
 0x1fd   : >> { %v2246_v60 = vpop.eup %2245  ;;  %1678 = vmatprep.subr.bf16.mxu1 %v2750_v59  ;;  %v1541_v15 = vadd.f32 %v1540_v24, %v1502_v1  ;;  %v1509_v59 = vunpack.c.h.bf16 %v2240_v10  ;;  %v1511_v3 = vunpack.c.l.bf16 %v2244_v0  ;;  %v1513_v46 = vunpack.c.h.bf16 %v2244_v0 }
 0x1fe   : >> { %v1577_v35 = vadd.f32 %v1576_v18, %v1501_v31  ;;  %1730 = vmatpush2.bf16.msra.mxu0 %v2246_v60  ;;  %v1514_v6 = vunpack.c.l.bf16 %v2246_v60  ;;  %v1516_v8 = vunpack.c.h.bf16 %v2246_v60 }
 0x1ff   : >> { %1731 = vmatprep.subr.bf16.mxu0 %v2244_v0  ;;  %v1542_v43 = vadd.f32 %v1541_v15, %v1504_v29  ;;  %v2248_v39 = vpop.eup %2247 }
 0x200   : >> { %v1578_v47 = vadd.f32 %v1577_v35, %v1503_v26  ;;  %1679 = vmatpush1.bf16.msra.mxu1 %v2742_v62  ;;  %v1510_v38 = vunpack.c.l.bf16 %v2248_v39  ;;  %v1512_v27 = vunpack.c.h.bf16 %v2248_v39 }
 0x201   : >> { %1680 = vmatprep.subr.bf16.mxu1 %v2966_v11  ;;  %v1543_v53 = vadd.f32 %v1542_v43, %v1506_v30  ;;  %v2254_v30 = vld [vmem:[%s2469_s7] ss:$12 sps:$4 sm:$0x1f]  }
 0x202   : >> { %v1579_v54 = vadd.f32 %v1578_v47, %v1505_v32  ;;  %1732 = vmatpush2.bf16.msra.mxu0 %v2248_v39 }
 0x203   : >> { %1733 = vmatprep.subr.bf16.mxu0 %v2240_v10  ;;  %v1544_v16 = vadd.f32 %v1543_v53, %v1508_v7 }
 0x204   : >> { %v1580_v45 = vadd.f32 %v1579_v54, %v1507_v9  ;;  %1681 = vmatpush1.bf16.msra.mxu1 %v2967_v25 }
 0x205   : >> { %1682 = vmatprep.subr.bf16.mxu1 %v2968_v12  ;;  %v1545_v62 = vadd.f32 %v1544_v16, %v1510_v38 }
 0x206   : >> { %v1581_v5 = vadd.f32 %v1580_v45, %v1509_v59  ;;  %1734 = vmatpush2.bf16.msra.mxu0 %v2854_v51  ;;  %v1661_v51 = vadd.f32 %v1660_v20, %v2865_v40 }
 0x207   : >> { %1735 = vmatprep.subr.bf16.mxu0 %v2706_v37  ;;  %v1546_v56 = vadd.f32 %v1545_v62, %v1512_v27 }
 0x208   : >> { %v1582_v49 = vadd.f32 %v1581_v5, %v1511_v3  ;;  %1683 = vmatpush1.bf16.msra.mxu1 %v2969_v21  ;;  %v1662_v2 = vrot.slane %v1661_v51, 2 }
 0x209   : >> { %1684 = vmatprep.subr.bf16.mxu1 %v2970_v61  ;;  %v1547_v44 = vadd.f32 %v1546_v56, %v1514_v6 }
 0x20a   : >> { %v1583_v33 = vadd.f32 %v1582_v49, %v1513_v46  ;;  %1736 = vmatpush2.bf16.msra.mxu0 %v2681_v23  ;;  %v1642_v23 = vadd.f32 %v1641_v48, %v1640_v58  ;;  %v1663_v31 = vadd.f32 %v1662_v2, %v1661_v51 }
 0x20b   : >> { %1737 = vmatprep.subr.bf16.mxu0 %v2876_v19  ;;  %v1548_v37 = vadd.f32 %v1547_v44, %v1516_v8 }
 0x20c   : >> { %v1584_v55 = vadd.f32 %v1583_v33, %v1515_v4  ;;  %1685 = vmatpush1.bf16.msra.mxu1 %v2971_v57  ;;  %v1643_v18 = vrot.slane %v1642_v23, 1  ;;  %v1664_v29 = vrot.slane %v1663_v31, 1 }
 0x20d   : >> { %v1549_v10 = vrot.slane %v1548_v37, 4 }
 0x20e   : >> { %v1585_v42 = vadd.f32 %v1584_v55, %v1517_v52  ;;  %1738 = vmatpush2.bf16.msra.mxu0 %v2870_v34  ;;  %v1644_v26 = vadd.f32 %v1643_v18, %v1642_v23 }
 0x20f   : >> { %1739 = vmatprep.subr.bf16.mxu0 %v2862_v63  ;;  %1703 = vmatmul.mubr.bf16.vlgmr.msra.gmra.mxu1 %v2253_v36  ;;  %v1550_v40 = vadd.f32 %v1549_v10, %v1548_v37 }
 0x210   : >> { %v1586_v1 = vrot.slane %v1585_v42, 4 }
 0x211   : >> { %v1551_v19 = vrot.slane %v1550_v40, 2 }
 0x212   : >> { %v1587_v24 = vadd.f32 %v1586_v1, %v1585_v42  ;;  %1740 = vmatpush2.bf16.msra.mxu0 %v2851_v17  ;;  %v1665_v17 = vadd.f32 %v1664_v29, %v1663_v31 }
 0x213   : >> { %1741 = vmatprep.subr.bf16.mxu0 %v2843_v13  ;;  %v1552_v41 = vadd.f32 %v1551_v19, %v1550_v40 }
 0x214   : >> { %v1588_v0 = vrot.slane %v1587_v24, 2 }
 0x215   : >> { %v1553_v60 = vrot.slane %v1552_v41, 1 }
 0x216   : >> { %v1589_v34 = vadd.f32 %v1588_v0, %v1587_v24  ;;  %1742 = vmatpush2.bf16.msra.mxu0 %v2836_v50 }
 0x217   : >> { %1743 = vmatprep.subr.bf16.mxu0 %v2821_v28  ;;  %v1554_v63 = vadd.f32 %v1553_v60, %v1552_v41 }
 0x218   : >> { %v1590_v35 = vrot.slane %v1589_v34, 1 }
 0x219   : >> { %v1666_v15 = vadd.f32 %v1644_v26, %v1554_v63 }
 0x21a   : >> { %v1591_v32 = vadd.f32 %v1590_v35, %v1589_v34  ;;  %1744 = vmatpush2.bf16.msra.mxu0 %v2808_v14 }
 0x21b   : >> { %v2040_v43 = vadd.f32 -152.0, %v1666_v15 }
 0x21c   : >> { %v1667_v13 = vadd.f32 %v1665_v17, %v1591_v32 }
 0x21d   : >> { %1746 = vmatmul.mubr.bf16.vlgmr.msra.gmra.mxu0 %v2254_v30  ;;  %2249 = vrcp.f32 %v2040_v43 }
 0x21e   : >> { %v2041_v47 = vadd.f32 -152.0, %v1667_v13 }
 0x220   : >> { %2251 = vrcp.f32 %v2041_v47 }
 0x22a   : >> { %v2250_v11 = vpop.eup %2249 }
 0x22d   : >> { %v2252_v38 = vpop.eup %2251 }
 0x2cf   : >> { %v1704_v50 = vpop.f32.mrf.mxu1 }
 0x2d1   : >> { %v1706_v39 = vpop.f32.mrf.mxu1 }
 0x2d3   : >> { %v1708_v53 = vpop.f32.mrf.mxu1 }
 0x2d5   : >> { %v1710_v45 = vpop.f32.mrf.mxu1 }
 0x2dd   : >> { %v1747_v28 = vpop.f32.mrf.mxu0 }
 0x2de   : >> { %v1748_v9 = vadd.f32 %v1747_v28, %v1704_v50 }
 0x2df   : >> { %v1749_v7 = vpop.f32.mrf.mxu0 }
 0x2e0   : >> { %v1758_v54 = vmul.f32 %v2250_v11, %v1748_v9  ;;  %v1750_v59 = vadd.f32 %v1749_v7, %v1706_v39 }
 0x2e1   : >> { %v1751_v14 = vpop.f32.mrf.mxu0 }
 0x2e2   : >> { %1764 = vst [vmem:[%s1763_s9] sm:$0xff] %v1758_v54  ;;  %v1759_v16 = vmul.f32 %v2252_v38, %v1750_v59  ;;  %v1752_v22 = vadd.f32 %v1751_v14, %v1708_v53 }
 0x2e3   : >> { %v1753_v25 = vpop.f32.mrf.mxu0 }
 0x2e4   : >> { %1765 = vst [vmem:[%s1763_s9 + $0x8] sm:$0xff] %v1759_v16  ;;  %v1760_v27 = vmul.f32 %v2250_v11, %v1752_v22  ;;  %v1754_v12 = vadd.f32 %v1753_v25, %v1710_v45  ;;  %689 = sbr.rel (!%p687_p7) target bundleno = 62 (0x3e), region = 213 }
 0x2e6   : >> { %1766 = vst [vmem:[%s1763_s9 + $0x10] sm:$0x1] %v1760_v27  ;;  %v1761_v62 = vmul.f32 %v2252_v38, %v1754_v12 }
 0x2e8   : >> { %1767 = vst [vmem:[%s1763_s9 + $0x18] sm:$0x1] %v1761_v62 }
 0x2e9 PF: > { %s14_s16 = sadd.s32 1, %s2332_s16   ;;  %s2972_s12 = smov %s2320_s13 }
 0x2ea   : > { %p11_p8 = scmp.ge.s32.totalorder %s14_s16, 4   ;;  %s2973_s13 = smov %s2415_s24 }
 0x2eb   : > { %s2974_s14 = smov %s2328_s15  ;;  %s2975_s15 = smov %s2977_s18 }
 0x2ec   :  { %13 = sbr.rel (!%p11_p8) target bundleno = 3 (0x3), region = 224 }
 0x2f1   :  { %1801 = vsyncpa [#allocation3], 1 }
 0x2f2   :  { %1803 = vsyncpa [#allocation3 + $0x1], 1 }

</bundles_post_ra>
